<compile_context>
chip_gen: v7x
topology: tpu7x:2x2x1
jax: 0.10.0
libtpu: 0.0.40
codegen_flags: <defaults>
</compile_context>

<pallas_src>
import functools

import jax
import jax.numpy as jnp
from jax import lax
from jax.experimental import pallas as pl
from jax.experimental.pallas import tpu as pltpu


def _bow_mlp_kernel(x_ref, w1_ref, b1_ref, w2_ref, b2_ref,
                    w3_ref, b3_ref, w4_ref, b4_ref, o_ref):
    bf16 = jnp.bfloat16
    # fc1 + relu: bf16 MXU operands, f32 accumulate, f32 bias/ReLU on the VPU.
    h = jnp.dot(x_ref[...], w1_ref[...], preferred_element_type=jnp.float32)
    h = jnp.maximum(h + b1_ref[...], 0.0)
    # fc2 + relu
    h = jnp.dot(h.astype(bf16), w2_ref[...], preferred_element_type=jnp.float32)
    h = jnp.maximum(h + b2_ref[...], 0.0)
    # fc3 + relu
    h = jnp.dot(h.astype(bf16), w3_ref[...], preferred_element_type=jnp.float32)
    h = jnp.maximum(h + b3_ref[...], 0.0)
    # Dropout: identity in eval mode.
    # TODO(synk): training-mode dropout (Bernoulli mask * 1/(1-p)) would use
    # pltpu.prng_seed + pltpu.stateful_bernoulli; omitted for inference parity.
    # fc4 (hidden -> 1): contract hidden of (1, hidden) with hidden of
    # (block_m, hidden) so the result is a lane-dense (1, block_m) row rather
    # than a degenerate 1-lane (block_m, 1) column.
    out = lax.dot_general(
        w4_ref[...], h.astype(bf16),
        dimension_numbers=(((1,), (1,)), ((), ())),
        preferred_element_type=jnp.float32)
    o_ref[...] = (out + b4_ref[...]).astype(o_ref.dtype)


@functools.partial(jax.jit, static_argnames=("block_m",))
def bow_model_forward(x, params, block_m=256):
    """x: (batch, vocab_size) float32 -> (batch, 1) float32."""
    w1, b1, w2, b2, w3, b3, w4, b4 = params
    batch, vocab = x.shape
    hidden = w1.shape[1]

    # Clamp the tile height for tiny batches (keep it a multiple of 8).
    block_m = max(8, min(block_m, ((batch + 7) // 8) * 8))
    num_blocks = (batch + block_m - 1) // block_m
    padded = num_blocks * block_m

    bf16 = jnp.bfloat16
    x_b = x.astype(bf16)                         # bf16 halves HBM bytes for the x stream
    if padded != batch:
        x_b = jnp.pad(x_b, ((0, padded - batch), (0, 0)))
    w1_b = w1.astype(bf16)
    w2_b = w2.astype(bf16)
    w3_b = w3.astype(bf16)
    w4_row = w4.reshape(1, hidden).astype(bf16)  # (1, hidden) row for lane-dense fc4
    b1f = b1.astype(jnp.float32)
    b2f = b2.astype(jnp.float32)
    b3f = b3.astype(jnp.float32)
    b4f = b4.reshape(1, 1).astype(jnp.float32)

    # Weights / biases are whole-resident with a constant block index, so the
    # pipeline does not re-DMA them per grid step.
    full = lambda shp: pl.BlockSpec(shp, lambda i: tuple(0 for _ in shp))

    out_slab = pl.pallas_call(
        _bow_mlp_kernel,
        out_shape=jax.ShapeDtypeStruct((num_blocks, 1, block_m), jnp.float32),
        grid_spec=pltpu.PrefetchScalarGridSpec(
            num_scalar_prefetch=0,
            grid=(num_blocks,),
            in_specs=[
                pl.BlockSpec((block_m, vocab), lambda i: (i, 0)),   # x tile (bf16)
                full((vocab, hidden)),                              # W1 (bf16)
                full((1, hidden)),                                  # b1 (f32)
                full((hidden, hidden)),                             # W2 (bf16)
                full((1, hidden)),                                  # b2 (f32)
                full((hidden, hidden)),                             # W3 (bf16)
                full((1, hidden)),                                  # b3 (f32)
                full((1, hidden)),                                  # W4 row (bf16)
                full((1, 1)),                                       # b4 (f32)
            ],
            # Lane-dense output slab: one (1, block_m) row per grid step.
            out_specs=pl.BlockSpec((None, 1, block_m), lambda i: (i, 0, 0)),
        ),
        compiler_params=pltpu.CompilerParams(
            dimension_semantics=("parallel",),
            vmem_limit_bytes=48 * 1024 * 1024,
        ),
    )(x_b, w1_b, b1f, w2_b, b2f, w3_b, b3f, w4_row, b4f)

    return out_slab.reshape(padded, 1)[:batch]


def init_params(key, vocab_size, hidden_size):
    """Deterministic init mirroring nn.Linear shapes (stored as (in, out))."""
    ks = jax.random.split(key, 8)

    def lin(kw, kb, fan_in, fan_out):
        bound = 1.0 / jnp.sqrt(fan_in)
        w = jax.random.uniform(kw, (fan_in, fan_out), jnp.float32, -bound, bound)
        b = jax.random.uniform(kb, (1, fan_out), jnp.float32, -bound, bound)
        return w, b

    w1, b1 = lin(ks[0], ks[1], vocab_size, hidden_size)
    w2, b2 = lin(ks[2], ks[3], hidden_size, hidden_size)
    w3, b3 = lin(ks[4], ks[5], hidden_size, hidden_size)
    w4, b4 = lin(ks[6], ks[7], hidden_size, 1)
    return (w1, b1, w2, b2, w3, b3, w4, b4)


def reference_forward_f32(x, params):
    """Exact f32 semantics of the PyTorch module in eval mode."""
    w1, b1, w2, b2, w3, b3, w4, b4 = params
    h = jnp.maximum(x @ w1 + b1, 0.0)
    h = jnp.maximum(h @ w2 + b2, 0.0)
    h = jnp.maximum(h @ w3 + b3, 0.0)
    return h @ w4 + b4


def reference_forward_bf16(x, params):
    """Reference with the same bf16-operand / f32-accumulate casts as the kernel."""
    w1, b1, w2, b2, w3, b3, w4, b4 = params
    bf = jnp.bfloat16
    dot = lambda a, b: jnp.dot(a.astype(bf), b.astype(bf),
                               preferred_element_type=jnp.float32)
    h = jnp.maximum(dot(x, w1) + b1, 0.0)
    h = jnp.maximum(dot(h, w2) + b2, 0.0)
    h = jnp.maximum(dot(h, w3) + b3, 0.0)
    return dot(h, w4) + b4


if __name__ == "__main__":
    vocab_size = 512
    hidden_size = 128
    batch = 512            # 2 grid steps at block_m=256 (lets v7x use both TCs)

    key = jax.random.PRNGKey(0)
    k_x, k_p = jax.random.split(key)
    # Bag-of-words counts (non-negative), float32 like the PyTorch module.
    x = jax.random.uniform(k_x, (batch, vocab_size), jnp.float32, 0.0, 3.0)
    params = init_params(k_p, vocab_size, hidden_size)

    out = jax.block_until_ready(bow_model_forward(x, params))
    assert out.shape == (batch, 1), out.shape

    # Tight check against a reference with the same bf16-operand casts.
    ref_b = reference_forward_bf16(x, params)
    assert jnp.allclose(out, ref_b, atol=1e-3, rtol=1e-3), (
        f"bf16-ref max abs err {jnp.max(jnp.abs(out - ref_b))}")
    # Looser check against the pure-f32 module semantics (bf16 operand noise).
    ref_f = reference_forward_f32(x, params)
    assert jnp.allclose(out, ref_f, atol=1e-1, rtol=1e-1), (
        f"f32-ref max abs err {jnp.max(jnp.abs(out - ref_f))}")

    print("KERNEL_OK")
</pallas_src>

<mosaic_0001>
module attributes {stable_mosaic.version = 11 : i64} {
  func.func @_bow_mlp_kernel(%arg0: i32, %arg1: memref<256x512xbf16, #tpu.memory_space<vmem>>, %arg2: memref<512x128xbf16, #tpu.memory_space<vmem>>, %arg3: memref<1x128xf32, #tpu.memory_space<vmem>>, %arg4: memref<128x128xbf16, #tpu.memory_space<vmem>>, %arg5: memref<1x128xf32, #tpu.memory_space<vmem>>, %arg6: memref<128x128xbf16, #tpu.memory_space<vmem>>, %arg7: memref<1x128xf32, #tpu.memory_space<vmem>>, %arg8: memref<1x128xbf16, #tpu.memory_space<vmem>>, %arg9: memref<1x1xf32, #tpu.memory_space<vmem>>, %arg10: memref<1x1x256xf32, #tpu.memory_space<vmem>>) attributes {dimension_semantics = [#tpu.dimension_semantics<parallel>], iteration_bounds = array<i64: 2>, scalar_prefetch = 0 : i64, scratch_operands = 0 : i64, tpu.core_type = #tpu.core_type<tc>, window_params = [{transform_indices = @transform_0, window_bounds = array<i64: 256, 512>}, {pipeline_mode = #tpu.pipeline_mode<synchronous>, transform_indices = @transform_1, window_bounds = array<i64: 512, 128>}, {pipeline_mode = #tpu.pipeline_mode<synchronous>, transform_indices = @transform_2, window_bounds = array<i64: 1, 128>}, {pipeline_mode = #tpu.pipeline_mode<synchronous>, transform_indices = @transform_3, window_bounds = array<i64: 128, 128>}, {pipeline_mode = #tpu.pipeline_mode<synchronous>, transform_indices = @transform_4, window_bounds = array<i64: 1, 128>}, {pipeline_mode = #tpu.pipeline_mode<synchronous>, transform_indices = @transform_5, window_bounds = array<i64: 128, 128>}, {pipeline_mode = #tpu.pipeline_mode<synchronous>, transform_indices = @transform_6, window_bounds = array<i64: 1, 128>}, {pipeline_mode = #tpu.pipeline_mode<synchronous>, transform_indices = @transform_7, window_bounds = array<i64: 1, 128>}, {pipeline_mode = #tpu.pipeline_mode<synchronous>, transform_indices = @transform_8, window_bounds = array<i64: 1, 1>}, {transform_indices = @transform_9, window_bounds = array<i64: 1, 1, 256>}]} {
    %c0 = arith.constant 0 : index
    %c0_0 = arith.constant 0 : index
    %0 = vector.load %arg1[%c0, %c0_0] : memref<256x512xbf16, #tpu.memory_space<vmem>>, vector<256x512xbf16>
    %c0_1 = arith.constant 0 : index
    %c0_2 = arith.constant 0 : index
    %1 = vector.load %arg2[%c0_1, %c0_2] : memref<512x128xbf16, #tpu.memory_space<vmem>>, vector<512x128xbf16>
    %cst = arith.constant dense<0.000000e+00> : vector<256x128xf32>
    %2 = tpu.matmul %0, %1, %cst {dimension_numbers = #tpu.dot_dimension_numbers<[1], [0], [0], [1], [0, 0, 1, 1], [], []>} : vector<256x512xbf16>, vector<512x128xbf16>, vector<256x128xf32> -> vector<256x128xf32>
    %c0_3 = arith.constant 0 : index
    %c0_4 = arith.constant 0 : index
    %3 = vector.load %arg3[%c0_3, %c0_4] : memref<1x128xf32, #tpu.memory_space<vmem>>, vector<1x128xf32>
    %4 = vector.broadcast %3 : vector<1x128xf32> to vector<256x128xf32>
    %5 = arith.addf %2, %4 : vector<256x128xf32>
    %cst_5 = arith.constant 0.000000e+00 : f32
    %6 = vector.broadcast %cst_5 : f32 to vector<256x128xf32>
    %7 = arith.maximumf %5, %6 : vector<256x128xf32>
    %8 = arith.truncf %7 : vector<256x128xf32> to vector<256x128xbf16>
    %c0_6 = arith.constant 0 : index
    %c0_7 = arith.constant 0 : index
    %9 = vector.load %arg4[%c0_6, %c0_7] : memref<128x128xbf16, #tpu.memory_space<vmem>>, vector<128x128xbf16>
    %cst_8 = arith.constant dense<0.000000e+00> : vector<256x128xf32>
    %10 = tpu.matmul %8, %9, %cst_8 {dimension_numbers = #tpu.dot_dimension_numbers<[1], [0], [0], [1], [0, 0, 1, 1], [], []>} : vector<256x128xbf16>, vector<128x128xbf16>, vector<256x128xf32> -> vector<256x128xf32>
    %c0_9 = arith.constant 0 : index
    %c0_10 = arith.constant 0 : index
    %11 = vector.load %arg5[%c0_9, %c0_10] : memref<1x128xf32, #tpu.memory_space<vmem>>, vector<1x128xf32>
    %12 = vector.broadcast %11 : vector<1x128xf32> to vector<256x128xf32>
    %13 = arith.addf %10, %12 : vector<256x128xf32>
    %cst_11 = arith.constant 0.000000e+00 : f32
    %14 = vector.broadcast %cst_11 : f32 to vector<256x128xf32>
    %15 = arith.maximumf %13, %14 : vector<256x128xf32>
    %16 = arith.truncf %15 : vector<256x128xf32> to vector<256x128xbf16>
    %c0_12 = arith.constant 0 : index
    %c0_13 = arith.constant 0 : index
    %17 = vector.load %arg6[%c0_12, %c0_13] : memref<128x128xbf16, #tpu.memory_space<vmem>>, vector<128x128xbf16>
    %cst_14 = arith.constant dense<0.000000e+00> : vector<256x128xf32>
    %18 = tpu.matmul %16, %17, %cst_14 {dimension_numbers = #tpu.dot_dimension_numbers<[1], [0], [0], [1], [0, 0, 1, 1], [], []>} : vector<256x128xbf16>, vector<128x128xbf16>, vector<256x128xf32> -> vector<256x128xf32>
    %c0_15 = arith.constant 0 : index
    %c0_16 = arith.constant 0 : index
    %19 = vector.load %arg7[%c0_15, %c0_16] : memref<1x128xf32, #tpu.memory_space<vmem>>, vector<1x128xf32>
    %20 = vector.broadcast %19 : vector<1x128xf32> to vector<256x128xf32>
    %21 = arith.addf %18, %20 : vector<256x128xf32>
    %cst_17 = arith.constant 0.000000e+00 : f32
    %22 = vector.broadcast %cst_17 : f32 to vector<256x128xf32>
    %23 = arith.maximumf %21, %22 : vector<256x128xf32>
    %c0_18 = arith.constant 0 : index
    %c0_19 = arith.constant 0 : index
    %24 = vector.load %arg8[%c0_18, %c0_19] : memref<1x128xbf16, #tpu.memory_space<vmem>>, vector<1x128xbf16>
    %25 = arith.truncf %23 : vector<256x128xf32> to vector<256x128xbf16>
    %cst_20 = arith.constant dense<0.000000e+00> : vector<1x256xf32>
    %26 = tpu.matmul %24, %25, %cst_20 {dimension_numbers = #tpu.dot_dimension_numbers<[1], [1], [0], [0], [0, 0, 1, 0], [], []>} : vector<1x128xbf16>, vector<256x128xbf16>, vector<1x256xf32> -> vector<1x256xf32>
    %c0_21 = arith.constant 0 : index
    %c0_22 = arith.constant 0 : index
    %27 = vector.load %arg9[%c0_21, %c0_22] : memref<1x1xf32, #tpu.memory_space<vmem>>, vector<1x1xf32>
    %28 = vector.broadcast %27 : vector<1x1xf32> to vector<1x256xf32>
    %29 = arith.addf %26, %28 : vector<1x256xf32>
    %c0_23 = arith.constant 0 : index
    %c0_24 = arith.constant 0 : index
    %c0_25 = arith.constant 0 : index
    %30 = vector.load %arg10[%c0_23, %c0_24, %c0_25] : memref<1x1x256xf32, #tpu.memory_space<vmem>>, vector<1x1x256xf32>
    %31 = vector.shape_cast %30 : vector<1x1x256xf32> to vector<1x256xf32>
    %32 = vector.shape_cast %29 : vector<1x256xf32> to vector<1x1x256xf32>
    tpu.vector_store %arg10[%c0_23, %c0_24, %c0_25], %32 {strides = array<i32>} : memref<1x1x256xf32, #tpu.memory_space<vmem>>, vector<1x1x256xf32>,
    return
  }
  func.func @transform_0(%arg0: i32) -> (i32, i32) {
    %c0_i32 = arith.constant 0 : i32
    %c0_i32_0 = arith.constant 0 : i32
    return %arg0, %c0_i32 : i32, i32
  }
  func.func @transform_1(%arg0: i32) -> (i32, i32) {
    %c0_i32 = arith.constant 0 : i32
    %c0_i32_0 = arith.constant 0 : i32
    %c0_i32_1 = arith.constant 0 : i32
    return %c0_i32, %c0_i32_0 : i32, i32
  }
  func.func @transform_2(%arg0: i32) -> (i32, i32) {
    %c0_i32 = arith.constant 0 : i32
    %c0_i32_0 = arith.constant 0 : i32
    %c0_i32_1 = arith.constant 0 : i32
    return %c0_i32, %c0_i32_0 : i32, i32
  }
  func.func @transform_3(%arg0: i32) -> (i32, i32) {
    %c0_i32 = arith.constant 0 : i32
    %c0_i32_0 = arith.constant 0 : i32
    %c0_i32_1 = arith.constant 0 : i32
    return %c0_i32, %c0_i32_0 : i32, i32
  }
  func.func @transform_4(%arg0: i32) -> (i32, i32) {
    %c0_i32 = arith.constant 0 : i32
    %c0_i32_0 = arith.constant 0 : i32
    %c0_i32_1 = arith.constant 0 : i32
    return %c0_i32, %c0_i32_0 : i32, i32
  }
  func.func @transform_5(%arg0: i32) -> (i32, i32) {
    %c0_i32 = arith.constant 0 : i32
    %c0_i32_0 = arith.constant 0 : i32
    %c0_i32_1 = arith.constant 0 : i32
    return %c0_i32, %c0_i32_0 : i32, i32
  }
  func.func @transform_6(%arg0: i32) -> (i32, i32) {
    %c0_i32 = arith.constant 0 : i32
    %c0_i32_0 = arith.constant 0 : i32
    %c0_i32_1 = arith.constant 0 : i32
    return %c0_i32, %c0_i32_0 : i32, i32
  }
  func.func @transform_7(%arg0: i32) -> (i32, i32) {
    %c0_i32 = arith.constant 0 : i32
    %c0_i32_0 = arith.constant 0 : i32
    %c0_i32_1 = arith.constant 0 : i32
    return %c0_i32, %c0_i32_0 : i32, i32
  }
  func.func @transform_8(%arg0: i32) -> (i32, i32) {
    %c0_i32 = arith.constant 0 : i32
    %c0_i32_0 = arith.constant 0 : i32
    %c0_i32_1 = arith.constant 0 : i32
    return %c0_i32, %c0_i32_0 : i32, i32
  }
  func.func @transform_9(%arg0: i32) -> (i32, i32, i32) {
    %c0_i32 = arith.constant 0 : i32
    %c0_i32_0 = arith.constant 0 : i32
    %c0_i32_1 = arith.constant 0 : i32
    return %arg0, %c0_i32, %c0_i32_0 : i32, i32, i32
  }
}

</mosaic_0001>

<bundles_post_ra>
// kernel: bow_model_forward.1
= control target key start
LH: loop header
LB: loop body
LE: loop exit
PB: predicated region body
PF: predicated region fallthrough
CT: control target
= control target key end

     0   :  { %s3336_s0 = inlined_call_operand.vmem [shape: bf16[512,512], index: 0, kind: input, shape index: {}]   ;;  %s3337_s1 = inlined_call_operand.vmem [shape: bf16[512,128], index: 1, kind: input, shape index: {}]   ;;  %s3338_s2 = inlined_call_operand.vmem [shape: f32[1,128], index: 2, kind: input, shape index: {}]   ;;  %s3339_s3 = inlined_call_operand.vmem [shape: bf16[128,128], index: 3, kind: input, shape index: {}]   ;;  %s3340_s4 = inlined_call_operand.vmem [shape: f32[1,128], index: 4, kind: input, shape index: {}]   ;;  %s3341_s5 = inlined_call_operand.vmem [shape: bf16[128,128], index: 5, kind: input, shape index: {}]   ;;  %s3342_s6 = inlined_call_operand.vmem [shape: f32[1,128], index: 6, kind: input, shape index: {}]   ;;  %s3343_s7 = inlined_call_operand.vmem [shape: bf16[1,128], index: 7, kind: input, shape index: {}]   ;;  %s3344_s8 = inlined_call_operand.<no memory space> [shape: f32[1,1], index: 8, kind: input, shape index: {}]   ;;  %s3345_s9 = inlined_call_operand.hbm [shape: f32[2,1,256], index: 9, kind: output, shape index: {}]  }
   0x1   :  { %v14_v0 = vstv %s3344_s8 }
   0x2   :  { %15 = vst [vmem:[#allocation2] sm:$0x1] %v14_v0 }
   0x3   :  { %16 = vsyncpa [#allocation4], 0 }
   0x4   :  { %18 = vsyncpa [#allocation4 + $0x1], 0  ;;  %s2887_s11 = smov 0   ;;  %s2889_s12 = smov 0  }
   0x5   :  { %s2891_s13 = smov 0   ;;  %s2893_s14 = smov 0  }
   0x6 LB: > { %s2064_s8 = sadd.s32 4294967295, %s2829_s14   ;;  %s2065_s15 = sadd.s32 4294967294, %s2829_s14   ;;  %s2829_s14 = sphi %s2893_s14, %s3351_s14   ;;  %s2825_s13 = sphi %s2891_s13, %s3350_s13   ;;  %s2821_s12 = sphi %s2889_s12, %s3349_s12   ;;  %s2817_s11 = sphi %s2887_s11, %s3348_s11  }
   0x7   : > { %s2910_s16 = sadd.s32 1, %s2829_s14   ;;  %s225_s17 = sadd.s32 1, %s2825_s13 }
   0x8   : > { %s222_s18 = ssub.s32 %s2829_s14, %s2910_s16  ;;  %p235_p0 = scmp.ne.s32.totalorder %s2825_s13, %s2821_s12 }
   0x9   : > { %p223_p1 = scmp.eq.s32.totalorder %s222_s18, 0  ;;  %p236_p2 = scmp.eq.s32.totalorder %s2064_s8, 1 }
   0xa   : > { %p241_p3 = scmp.ne.s32.totalorder %s2821_s12, %s2817_s11  ;;  %p242_p4 = scmp.eq.s32.totalorder %s2065_s15, 1 }
   0xb   : > { %s2922_s19 = scalar_select %p223_p1, %s2825_s13, %s225_s17  }
   0xc   : > { %p2924_p5 = por %p236_p2, %p235_p0  ;;  %p2928_p6 = por %p242_p4, %p241_p3 }
   0xd   : > { %p2068_p7 = scmp.ge.s32.totalorder %s2829_s14, 1  ;;  %p294_p8 = scmp.lt.s32.totalorder %s2829_s14, 3 }
   0xf   : > { %p295_p9 = pnand %p2068_p7, %p294_p8 }
  0x10   : > { %v2623_v1 = vld [vmem:[%s3337_s1 + $0x40] sm:$0xff] (!%p295_p9)   ;;  %v2627_v5 = vld [vmem:[%s3337_s1 + $0x48] sm:$0xff] (!%p295_p9)   ;;  %v2631_v9 = vld [vmem:[%s3337_s1 + $0x50] sm:$0xff] (!%p295_p9)   ;;  %s2984_s28 = sshll.u32 (!%p295_p9), %s2064_s8, 5  ;;  %s328_s29 = sand.u32 (!%p295_p9), 1, %s2821_s12  }
  0x11   : > { %298 = sbr.rel (%p295_p9) target bundleno = 1089 (0x441), region = 56  ;;  %v2624_v2 = vld [vmem:[%s3337_s1 + $0xc0] sm:$0xff] (!%p295_p9)   ;;  %2195 = vmatprep.subr.bf16.mxu0 (!%p295_p9), %v2623_v1  ;;  %v2628_v6 = vld [vmem:[%s3337_s1 + $0xc8] sm:$0xff] (!%p295_p9)   ;;  %v2632_v10 = vld [vmem:[%s3337_s1 + $0xd0] sm:$0xff] (!%p295_p9)   ;;  %p332_p10 = scmp.lt.s32.totalorder (!%p295_p9), %s2984_s28, 63 }
  0x12   : > { %v2625_v3 = vld [vmem:[%s3337_s1] sm:$0xff] (!%p295_p9)   ;;  %2307 = vmatprep.subr.bf16.mxu1 (!%p295_p9), %v2624_v2  ;;  %v2629_v7 = vld [vmem:[%s3337_s1 + $0x8] sm:$0xff] (!%p295_p9)   ;;  %v2633_v11 = vld [vmem:[%s3337_s1 + $0x10] sm:$0xff] (!%p295_p9)   ;;  %s2069_s10 = sshll.u32 (!%p295_p9), %s328_s29, 1  ;;  %s3294_s8 = scalar_lea.hbm (!%p295_p9), %s3345_s9, %s2984_s28 }
  0x13   : > { %v2626_v4 = vld [vmem:[%s3337_s1 + $0x80] sm:$0xff] (!%p295_p9)   ;;  %2196 = vmatpush3.bf16.msra.mxu0 (!%p295_p9), %v2625_v3  ;;  %v2630_v8 = vld [vmem:[%s3337_s1 + $0x88] sm:$0xff] (!%p295_p9)   ;;  %v2634_v12 = vld [vmem:[%s3337_s1 + $0x90] sm:$0xff] (!%p295_p9)   ;;  %s330_s15 = scalar_lea.vmem (!%p295_p9), [#allocation3], %s2069_s10  ;;  %s2833_s24 = smov (!%p295_p9), [#allocation3]  }
  0x14   : > { %2308 = vmatpush3.bf16.msra.mxu1 (!%p295_p9), %v2626_v4  ;;  %2197 = vmatprep.subr.bf16.mxu0 (!%p295_p9), %v2627_v5  ;;  %v2635_v13 = vld [vmem:[%s3337_s1 + $0x58] sm:$0xff] (!%p295_p9)   ;;  %v2639_v17 = vld [vmem:[%s3337_s1 + $0x60] sm:$0xff] (!%p295_p9)   ;;  %v2643_v21 = vld [vmem:[%s3337_s1 + $0x68] sm:$0xff] (!%p295_p9)   ;;  %s2006_s17 = sshll.u32 (!%p295_p9), %s330_s15, 4  ;;  %s2771_s26 = sshll.u32 (!%p295_p9), %s2833_s24, 4  ;;  %s3296_s17 = int_to_ptr.vmem [resolvable:$true] %s2006_s17  ;;  %s2772_s26 = int_to_ptr.vmem [resolvable:$false] %s2771_s26 }
  0x15   : > { %2309 = vmatprep.subr.bf16.mxu1 (!%p295_p9), %v2628_v6  ;;  %v2636_v14 = vld [vmem:[%s3337_s1 + $0xd8] sm:$0xff] (!%p295_p9)   ;;  %v2640_v18 = vld [vmem:[%s3337_s1 + $0xe0] sm:$0xff] (!%p295_p9)   ;;  %v2644_v22 = vld [vmem:[%s3337_s1 + $0xe8] sm:$0xff] (!%p295_p9)   ;;  %s2767_s23 = scalar_lea.vmem (!%p295_p9), %s3296_s17, 32  ;;  %p2774_p0 = scmp.lt.s32.totalorder (!%p295_p9), %s3296_s17, %s2772_s26 }
  0x16   : > { %v2637_v15 = vld [vmem:[%s3337_s1 + $0x18] sm:$0xff] (!%p295_p9)   ;;  %v2641_v19 = vld [vmem:[%s3337_s1 + $0x20] sm:$0xff] (!%p295_p9)   ;;  %v2645_v23 = vld [vmem:[%s3337_s1 + $0x28] sm:$0xff] (!%p295_p9)   ;;  %p2768_p11 = scmp.ne.s32.totalorder (!%p295_p9), %s3296_s17, %s2767_s23 }
  0x17   : > { %2198 = vmatpush3.bf16.msra.mxu0 (!%p295_p9), %v2629_v7  ;;  %v2638_v16 = vld [vmem:[%s3337_s1 + $0x98] sm:$0xff] (!%p295_p9)   ;;  %v2642_v20 = vld [vmem:[%s3337_s1 + $0xa0] sm:$0xff] (!%p295_p9)   ;;  %v2646_v24 = vld [vmem:[%s3337_s1 + $0xa8] sm:$0xff] (!%p295_p9)  }
  0x18   : > { %2310 = vmatpush3.bf16.msra.mxu1 %v2630_v8  ;;  %2199 = vmatprep.subr.bf16.mxu0 %v2631_v9  ;;  %s333_s30 = scalar_select %p332_p10, %s2984_s28, 63  ;;  %v2647_v25 = vld [vmem:[%s3337_s1 + $0x70] sm:$0xff]   ;;  %v2651_v29 = vld [vmem:[%s3337_s1 + $0x78] sm:$0xff]   ;;  %v2751_v59 = vld [vmem:[%s3339_s3] sm:$0xff]  }
  0x19   : > { %2311 = vmatprep.subr.bf16.mxu1 %v2632_v10  ;;  %v2648_v26 = vld [vmem:[%s3337_s1 + $0xf0] sm:$0xff]   ;;  %v2652_v30 = vld [vmem:[%s3337_s1 + $0xf8] sm:$0xff]   ;;  %v2752_v60 = vld [vmem:[%s3339_s3 + $0x8] sm:$0xff]   ;;  %p2769_p12 = pnand %p2768_p11, %p2924_p5 }
  0x1a   : > { %v2649_v27 = vld [vmem:[%s3337_s1 + $0x30] sm:$0xff]   ;;  %s2193_s25 = sshll.u32 %s333_s30, 4  ;;  %v2653_v31 = vld [vmem:[%s3337_s1 + $0x38] sm:$0xff]   ;;  %v2755_v4 = vld [vmem:[%s3339_s3 + $0x20] sm:$0xff]   ;;  %s1992_s30 = scalar_lea.sflag [#allocation4], %s328_s29 }
  0x1b   : > { %2200 = vmatpush3.bf16.msra.mxu0 %v2633_v11  ;;  %v2650_v28 = vld [vmem:[%s3337_s1 + $0xb0] sm:$0xff]   ;;  %s3033_s22 = scalar_lea.vmem %s3336_s0, %s2193_s25  ;;  %v2654_v32 = vld [vmem:[%s3337_s1 + $0xb8] sm:$0xff]   ;;  %p2770_p13 = pneg %p2769_p12 }
  0x1c   : > { %2312 = vmatpush3.bf16.msra.mxu1 %v2634_v12  ;;  %2201 = vmatprep.subr.bf16.mxu0 %v2635_v13  ;;  %v2655_v33 = vld [vmem:[%s3033_s22] ss:$16 sps:$4 sm:$0xff]   ;;  %v2657_v34 = vld [vmem:[%s3033_s22 + $0x4] ss:$16 sps:$4 sm:$0xff]   ;;  %v2658_v35 = vld [vmem:[%s3033_s22 + $0x8] ss:$16 sps:$4 sm:$0xff]  }
  0x1d   : > { %2313 = vmatprep.subr.bf16.mxu1 %v2636_v14  ;;  %v2660_v36 = vld [vmem:[%s3033_s22 + $0xc] ss:$16 sps:$4 sm:$0xff]   ;;  %1018 = vmatprep.mubr.bf16.mxu0 %v2657_v34  ;;  %v2661_v37 = vld [vmem:[%s3033_s22 + $0x24] ss:$16 sps:$4 sm:$0xff]   ;;  %v2665_v39 = vld [vmem:[%s3033_s22 + $0x20] ss:$16 sps:$4 sm:$0xff]  }
  0x1e   : > { %1179 = vmatprep.mubr.bf16.mxu1 %v2660_v36  ;;  %v2663_v38 = vld [vmem:[%s3033_s22 + $0x2c] ss:$16 sps:$4 sm:$0xff]   ;;  %v2666_v40 = vld [vmem:[%s3033_s22 + $0x28] ss:$16 sps:$4 sm:$0xff]   ;;  %v2667_v41 = vld [vmem:[%s3033_s22 + $0x44] ss:$16 sps:$4 sm:$0xff]  }
  0x1f   : > { %2202 = vmatpush3.bf16.msra.mxu0 %v2637_v15  ;;  %v2669_v42 = vld [vmem:[%s3033_s22 + $0x4c] ss:$16 sps:$4 sm:$0xff]   ;;  %v2671_v43 = vld [vmem:[%s3033_s22 + $0x40] ss:$16 sps:$4 sm:$0xff]   ;;  %v2672_v44 = vld [vmem:[%s3033_s22 + $0x48] ss:$16 sps:$4 sm:$0xff]  }
  0x20   : > { %2314 = vmatpush3.bf16.msra.mxu1 %v2638_v16  ;;  %2203 = vmatprep.subr.bf16.mxu0 %v2639_v17  ;;  %v2673_v45 = vld [vmem:[%s3033_s22 + $0x64] ss:$16 sps:$4 sm:$0xff]   ;;  %v2675_v46 = vld [vmem:[%s3033_s22 + $0x6c] ss:$16 sps:$4 sm:$0xff]   ;;  %v2677_v47 = vld [vmem:[%s3033_s22 + $0x60] ss:$16 sps:$4 sm:$0xff]  }
  0x21   : > { %2315 = vmatprep.subr.bf16.mxu1 %v2640_v18  ;;  %v2678_v48 = vld [vmem:[%s3033_s22 + $0x68] ss:$16 sps:$4 sm:$0xff]   ;;  %v2679_v49 = vld [vmem:[%s3033_s22 + $0x84] ss:$16 sps:$4 sm:$0xff]   ;;  %v2681_v50 = vld [vmem:[%s3033_s22 + $0x8c] ss:$16 sps:$4 sm:$0xff]  }
  0x22   : > { %v2683_v51 = vld [vmem:[%s3033_s22 + $0x80] ss:$16 sps:$4 sm:$0xff]   ;;  %v2684_v52 = vld [vmem:[%s3033_s22 + $0x88] ss:$16 sps:$4 sm:$0xff]   ;;  %v2685_v53 = vld [vmem:[%s3033_s22 + $0xa4] ss:$16 sps:$4 sm:$0xff]  }
  0x23   : > { %2204 = vmatpush3.bf16.msra.mxu0 %v2641_v19  ;;  %v2687_v54 = vld [vmem:[%s3033_s22 + $0xac] ss:$16 sps:$4 sm:$0xff]   ;;  %v2689_v55 = vld [vmem:[%s3033_s22 + $0xa0] ss:$16 sps:$4 sm:$0xff]   ;;  %v2690_v56 = vld [vmem:[%s3033_s22 + $0xa8] ss:$16 sps:$4 sm:$0xff]  }
  0x24   : > { %2316 = vmatpush3.bf16.msra.mxu1 %v2642_v20  ;;  %2205 = vmatprep.subr.bf16.mxu0 %v2643_v21  ;;  %v2691_v57 = vld [vmem:[%s3033_s22 + $0xc4] ss:$16 sps:$4 sm:$0xff]   ;;  %v2693_v58 = vld [vmem:[%s3033_s22 + $0xcc] ss:$16 sps:$4 sm:$0xff]   ;;  %v2695_v61 = vld [vmem:[%s3033_s22 + $0xc0] ss:$16 sps:$4 sm:$0xff]  }
  0x25   : > { %2317 = vmatprep.subr.bf16.mxu1 %v2644_v22  ;;  %v2696_v62 = vld [vmem:[%s3033_s22 + $0xc8] ss:$16 sps:$4 sm:$0xff]   ;;  %v2697_v63 = vld [vmem:[%s3033_s22 + $0xe4] ss:$16 sps:$4 sm:$0xff]   ;;  %v2699_v1 = vld [vmem:[%s3033_s22 + $0xec] ss:$16 sps:$4 sm:$0xff]  }
  0x26   : > { %v2753_v0 = vld [vmem:[%s3339_s3 + $0x10] sm:$0xff]   ;;  %v2754_v2 = vld [vmem:[%s3339_s3 + $0x18] sm:$0xff]   ;;  %s2773_s25 = scalar_lea.vmem %s2772_s26, 64 }
  0x27   : > { %2206 = vmatpush3.bf16.msra.mxu0 %v2645_v23  ;;  %v2701_v3 = vld [vmem:[%s3033_s22 + $0xe0] ss:$16 sps:$4 sm:$0xff]   ;;  %v2702_v5 = vld [vmem:[%s3033_s22 + $0xe8] ss:$16 sps:$4 sm:$0xff]   ;;  %v2703_v6 = vld [vmem:[%s3033_s22 + $0x104] ss:$16 sps:$4 sm:$0xff]   ;;  %p2775_p1 = scmp.lt.s32.totalorder %s2773_s25, %s2767_s23 }
  0x28   : > { %2318 = vmatpush3.bf16.msra.mxu1 %v2646_v24  ;;  %2207 = vmatprep.subr.bf16.mxu0 %v2647_v25  ;;  %v2705_v7 = vld [vmem:[%s3033_s22 + $0x10c] ss:$16 sps:$4 sm:$0xff]   ;;  %v2707_v8 = vld [vmem:[%s3033_s22 + $0x100] ss:$16 sps:$4 sm:$0xff]   ;;  %v2708_v9 = vld [vmem:[%s3033_s22 + $0x108] ss:$16 sps:$4 sm:$0xff]  }
  0x29   : > { %2319 = vmatprep.subr.bf16.mxu1 %v2648_v26  ;;  %v2709_v10 = vld [vmem:[%s3033_s22 + $0x124] ss:$16 sps:$4 sm:$0xff]   ;;  %v2711_v11 = vld [vmem:[%s3033_s22 + $0x12c] ss:$16 sps:$4 sm:$0xff]   ;;  %v2713_v12 = vld [vmem:[%s3033_s22 + $0x120] ss:$16 sps:$4 sm:$0xff]   ;;  %p2776_p2 = por %p2775_p1, %p2774_p0 }
  0x2a   : > { %v2714_v13 = vld [vmem:[%s3033_s22 + $0x128] ss:$16 sps:$4 sm:$0xff]   ;;  %v2715_v14 = vld [vmem:[%s3033_s22 + $0x144] ss:$16 sps:$4 sm:$0xff]   ;;  %v2717_v15 = vld [vmem:[%s3033_s22 + $0x14c] ss:$16 sps:$4 sm:$0xff]  }
  0x2b   : > { %2208 = vmatpush3.bf16.msra.mxu0 %v2649_v27  ;;  %v2719_v16 = vld [vmem:[%s3033_s22 + $0x140] ss:$16 sps:$4 sm:$0xff]   ;;  %v2720_v17 = vld [vmem:[%s3033_s22 + $0x148] ss:$16 sps:$4 sm:$0xff]   ;;  %v2721_v18 = vld [vmem:[%s3033_s22 + $0x164] ss:$16 sps:$4 sm:$0xff]   ;;  %p2777_p3 = pnand %p2776_p2, %p2770_p13 }
  0x2c   : > { %2320 = vmatpush3.bf16.msra.mxu1 %v2650_v28  ;;  %2209 = vmatprep.subr.bf16.mxu0 %v2651_v29  ;;  %v2723_v19 = vld [vmem:[%s3033_s22 + $0x16c] ss:$16 sps:$4 sm:$0xff]   ;;  %v2725_v20 = vld [vmem:[%s3033_s22 + $0x160] ss:$16 sps:$4 sm:$0xff]   ;;  %v2726_v21 = vld [vmem:[%s3033_s22 + $0x168] ss:$16 sps:$4 sm:$0xff]  }
  0x2d   : > { %2321 = vmatprep.subr.bf16.mxu1 %v2652_v30  ;;  %v2727_v22 = vld [vmem:[%s3033_s22 + $0x184] ss:$16 sps:$4 sm:$0xff]   ;;  %v2729_v23 = vld [vmem:[%s3033_s22 + $0x18c] ss:$16 sps:$4 sm:$0xff]   ;;  %v2731_v24 = vld [vmem:[%s3033_s22 + $0x180] ss:$16 sps:$4 sm:$0xff]  }
  0x2e   : > { %v2756_v25 = vld [vmem:[%s3339_s3 + $0x28] sm:$0xff]   ;;  %v2733_v27 = vld [vmem:[%s3033_s22 + $0x1a4] ss:$16 sps:$4 sm:$0xff]   ;;  %v2737_v30 = vld [vmem:[%s3033_s22 + $0x1a0] ss:$16 sps:$4 sm:$0xff]  }
  0x2f   : > { %2210 = vmatpush3.bf16.msra.mxu0 %v2653_v31  ;;  %v2732_v26 = vld [vmem:[%s3033_s22 + $0x188] ss:$16 sps:$4 sm:$0xff]   ;;  %v2735_v28 = vld [vmem:[%s3033_s22 + $0x1ac] ss:$16 sps:$4 sm:$0xff]   ;;  %v2757_v29 = vld [vmem:[%s3339_s3 + $0x30] sm:$0xff]  }
  0x30   : > { %2322 = vmatpush3.bf16.msra.mxu1 %v2654_v32  ;;  %2485 = vmatprep.subr.bf16.mxu0 %v2751_v59  ;;  %v2758_v31 = vld [vmem:[%s3339_s3 + $0x38] sm:$0xff]  }
  0x31   : > { %v2738_v32 = vld [vmem:[%s3033_s22 + $0x1a8] ss:$16 sps:$4 sm:$0xff]   ;;  %v2741_v34 = vld [vmem:[%s3033_s22 + $0x1cc] ss:$16 sps:$4 sm:$0xff]  }
  0x32   : > { %1019 = vmatmul.mubr.bf16.vlgmr.msra.gmra.mrb[0].mxu0 %v2655_v33  ;;  %v2739_v33 = vld [vmem:[%s3033_s22 + $0x1c4] ss:$16 sps:$4 sm:$0xff]   ;;  %v2744_v36 = vld [vmem:[%s3033_s22 + $0x1c8] ss:$16 sps:$4 sm:$0xff]  }
  0x33   : > { %1180 = vmatmul.mubr.bf16.vlgmr.msra.gmra.mrb[0].mxu1 %v2658_v35  ;;  %1026 = vmatprep.mubr.bf16.mxu0 %v2661_v37  ;;  %v2743_v35 = vld [vmem:[%s3033_s22 + $0x1c0] ss:$16 sps:$4 sm:$0xff]   ;;  %v2745_v37 = vld [vmem:[%s3033_s22 + $0x1e4] ss:$16 sps:$4 sm:$0xff]  }
  0x34   : > { %1187 = vmatprep.mubr.bf16.mxu1 %v2663_v38  ;;  %2486 = vmatpush3.bf16.msra.mxu0 %v2751_v59  ;;  %v2747_v38 = vld [vmem:[%s3033_s22 + $0x1ec] ss:$16 sps:$4 sm:$0xff]  }
  0x35   : > { %2487 = vmatprep.subr.bf16.mxu0 %v2752_v60 }
  0x38   : > { %2488 = vmatpush3.bf16.msra.mxu0 %v2752_v60 }
  0x39   : > { %2489 = vmatprep.subr.bf16.mxu0 %v2753_v0 }
  0x3a   : > { %1027 = vmatmul.mubr.bf16.gmra.mrb[4].mxu0 %v2665_v39  ;;  %v2749_v39 = vld [vmem:[%s3033_s22 + $0x1e0] ss:$16 sps:$4 sm:$0xff]  }
  0x3b   : > { %1188 = vmatmul.mubr.bf16.gmra.mrb[4].mxu1 %v2666_v40  ;;  %1034 = vmatprep.mubr.bf16.mxu0 %v2667_v41  ;;  %v2750_v40 = vld [vmem:[%s3033_s22 + $0x1e8] ss:$16 sps:$4 sm:$0xff]  }
  0x3c   : > { %1195 = vmatprep.mubr.bf16.mxu1 %v2669_v42  ;;  %2490 = vmatpush3.bf16.msra.mxu0 %v2753_v0 }
  0x3d   : > { %2491 = vmatprep.subr.bf16.mxu0 %v2754_v2 }
  0x40   : > { %2492 = vmatpush3.bf16.msra.mxu0 %v2754_v2 }
  0x41   : > { %2493 = vmatprep.subr.bf16.mxu0 %v2755_v4 }
  0x42   : > { %1035 = vmatmul.mubr.bf16.gmra.mrb[8].mxu0 %v2671_v43  ;;  %v3132_v43 = vld [vmem:[%s3338_s2] ss:$0 sm:$0xff] }
  0x43   : > { %1196 = vmatmul.mubr.bf16.gmra.mrb[8].mxu1 %v2672_v44  ;;  %1042 = vmatprep.mubr.bf16.mxu0 %v2673_v45 }
  0x44   : > { %1203 = vmatprep.mubr.bf16.mxu1 %v2675_v46  ;;  %2494 = vmatpush3.bf16.msra.mxu0 %v2755_v4  ;;  %v2761_v4 = vld [vmem:[%s3341_s5 + $0x10] sm:$0xff]  }
  0x45   : > { %2495 = vmatprep.subr.bf16.mxu0 %v2756_v25 }
  0x48   : > { %2496 = vmatpush3.bf16.msra.mxu0 %v2756_v25  ;;  %v2763_v25 = vld [vmem:[%s3341_s5 + $0x20] sm:$0xff]  }
  0x49   : > { %2497 = vmatprep.subr.bf16.mxu0 %v2757_v29 }
  0x4a   : > { %1043 = vmatmul.mubr.bf16.gmra.mrb[12].mxu0 %v2677_v47 }
  0x4b   : > { %1204 = vmatmul.mubr.bf16.gmra.mrb[12].mxu1 %v2678_v48  ;;  %1050 = vmatprep.mubr.bf16.mxu0 %v2679_v49 }
  0x4c   : > { %1211 = vmatprep.mubr.bf16.mxu1 %v2681_v50  ;;  %2498 = vmatpush3.bf16.msra.mxu0 %v2757_v29 }
  0x4d   : > { %2499 = vmatprep.subr.bf16.mxu0 %v2758_v31 }
  0x50   : > { %2500 = vmatpush3.bf16.msra.mxu0 %v2758_v31 }
  0x52   : > { %1051 = vmatmul.mubr.bf16.gmra.mrb[16].mxu0 %v2683_v51 }
  0x53   : > { %1212 = vmatmul.mubr.bf16.gmra.mrb[16].mxu1 %v2684_v52  ;;  %1058 = vmatprep.mubr.bf16.mxu0 %v2685_v53 }
  0x54   : > { %1219 = vmatprep.mubr.bf16.mxu1 %v2687_v54 }
  0x5a   : > { %1059 = vmatmul.mubr.bf16.gmra.mrb[20].mxu0 %v2689_v55 }
  0x5b   : > { %1220 = vmatmul.mubr.bf16.gmra.mrb[20].mxu1 %v2690_v56  ;;  %1066 = vmatprep.mubr.bf16.mxu0 %v2691_v57  ;;  %v2759_v57 = vld [vmem:[%s3341_s5] sm:$0xff]  }
  0x5c   : > { %1227 = vmatprep.mubr.bf16.mxu1 %v2693_v58  ;;  %v2760_v58 = vld [vmem:[%s3341_s5 + $0x8] sm:$0xff]   ;;  %2533 = vmatprep.subr.bf16.mxu1 %v2759_v57 }
  0x5d   : > { %2534 = vmatpush3.bf16.msra.mxu1 %v2759_v57 }
  0x5e   : > { %2535 = vmatprep.subr.bf16.mxu1 %v2760_v58 }
  0x61   : > { %2536 = vmatpush3.bf16.msra.mxu1 %v2760_v58 }
  0x62   : > { %1067 = vmatmul.mubr.bf16.gmra.mrb[24].mxu0 %v2695_v61  ;;  %2537 = vmatprep.subr.bf16.mxu1 %v2761_v4 }
  0x63   : > { %1228 = vmatmul.mubr.bf16.gmra.mrb[24].mxu1 %v2696_v62  ;;  %1074 = vmatprep.mubr.bf16.mxu0 %v2697_v63 }
  0x64   : > { %1235 = vmatprep.mubr.bf16.mxu1 %v2699_v1 }
  0x65   : > { %2538 = vmatpush3.bf16.msra.mxu1 %v2761_v4 }
  0x6a   : > { %1075 = vmatmul.mubr.bf16.gmra.mrb[28].mxu0 %v2701_v3 }
  0x6b   : > { %1236 = vmatmul.mubr.bf16.gmra.mrb[28].mxu1 %v2702_v5  ;;  %1082 = vmatprep.mubr.bf16.mxu0 %v2703_v6 }
  0x6c   : > { %1243 = vmatprep.mubr.bf16.mxu1 %v2705_v7 }
  0x72   : > { %1083 = vmatmul.mubr.bf16.gmra.mrb[32].mxu0 %v2707_v8 }
  0x73   : > { %1244 = vmatmul.mubr.bf16.gmra.mrb[32].mxu1 %v2708_v9  ;;  %1090 = vmatprep.mubr.bf16.mxu0 %v2709_v10 }
  0x74   : > { %1251 = vmatprep.mubr.bf16.mxu1 %v2711_v11 }
  0x7a   : > { %1091 = vmatmul.mubr.bf16.gmra.mrb[36].mxu0 %v2713_v12 }
  0x7b   : > { %1252 = vmatmul.mubr.bf16.gmra.mrb[36].mxu1 %v2714_v13  ;;  %1098 = vmatprep.mubr.bf16.mxu0 %v2715_v14 }
  0x7c   : > { %1259 = vmatprep.mubr.bf16.mxu1 %v2717_v15  ;;  %v2762_v15 = vld [vmem:[%s3341_s5 + $0x18] sm:$0xff]  }
  0x7d   : > { %2539 = vmatprep.subr.bf16.mxu1 %v2762_v15 }
  0x7e   : > { %2540 = vmatpush3.bf16.msra.mxu1 %v2762_v15 }
  0x7f   : > { %2541 = vmatprep.subr.bf16.mxu1 %v2763_v25 }
  0x82   : > { %1099 = vmatmul.mubr.bf16.gmra.mrb[40].mxu0 %v2719_v16  ;;  %2542 = vmatpush3.bf16.msra.mxu1 %v2763_v25 }
  0x83   : > { %1260 = vmatmul.mubr.bf16.gmra.mrb[40].mxu1 %v2720_v17  ;;  %1106 = vmatprep.mubr.bf16.mxu0 %v2721_v18 }
  0x84   : > { %1267 = vmatprep.mubr.bf16.mxu1 %v2723_v19 }
  0x8a   : > { %1107 = vmatmul.mubr.bf16.gmra.mrb[44].mxu0 %v2725_v20 }
  0x8b   : > { %1268 = vmatmul.mubr.bf16.gmra.mrb[44].mxu1 %v2726_v21  ;;  %1114 = vmatprep.mubr.bf16.mxu0 %v2727_v22 }
  0x8c   : > { %1275 = vmatprep.mubr.bf16.mxu1 %v2729_v23 }
  0x92   : > { %1115 = vmatmul.mubr.bf16.gmra.mrb[48].mxu0 %v2731_v24 }
  0x93   : > { %1276 = vmatmul.mubr.bf16.gmra.mrb[48].mxu1 %v2732_v26  ;;  %1122 = vmatprep.mubr.bf16.mxu0 %v2733_v27 }
  0x94   : > { %1283 = vmatprep.mubr.bf16.mxu1 %v2735_v28 }
  0x9a   : > { %1123 = vmatmul.mubr.bf16.gmra.mrb[52].mxu0 %v2737_v30 }
  0x9b   : > { %1284 = vmatmul.mubr.bf16.gmra.mrb[52].mxu1 %v2738_v32  ;;  %1130 = vmatprep.mubr.bf16.mxu0 %v2739_v33 }
  0x9c   : > { %1291 = vmatprep.mubr.bf16.mxu1 %v2741_v34 }
  0xa2   : > { %1131 = vmatmul.mubr.bf16.gmra.mrb[56].mxu0 %v2743_v35 }
  0xa3   : > { %1292 = vmatmul.mubr.bf16.gmra.mrb[56].mxu1 %v2744_v36  ;;  %1138 = vmatprep.mubr.bf16.mxu0 %v2745_v37  ;;  %v2764_v36 = vld [vmem:[%s3341_s5 + $0x28] sm:$0xff]  }
  0xa4   : > { %1299 = vmatprep.mubr.bf16.mxu1 %v2747_v38  ;;  %2543 = vmatprep.subr.bf16.mxu1 %v2764_v36 }
  0xa5   : > { %2544 = vmatpush3.bf16.msra.mxu1 %v2764_v36 }
  0xaa   : > { %1139 = vmatmul.mubr.bf16.gmra.mrb[60].mxu0 %v2749_v39 }
  0xab   : > { %1300 = vmatmul.mubr.bf16.gmra.mrb[60].mxu1 %v2750_v40 }
 0x105   : > { %v2211_v41 = vpop.f32.mrb[0].mxu0 }
 0x106   : > { %v2323_v42 = vpop.f32.mrb[0].mxu1  ;;  %v2212_v44 = vpop.f32.mrb[1].mxu0 }
 0x107   : > { %v2213_v45 = vadd.f32 %v2212_v44, %v2211_v41  ;;  %v2324_v46 = vpop.f32.mrb[1].mxu1  ;;  %v2214_v47 = vpop.f32.mrb[2].mxu0 }
 0x108   : > { %v2325_v48 = vadd.f32 %v2324_v46, %v2323_v42  ;;  %v2326_v49 = vpop.f32.mrb[2].mxu1  ;;  %v2215_v50 = vpop.f32.mrb[3].mxu0 }
 0x109   : > { %v1021_v51 = vadd.f32 %v2213_v45, %v3132_v43  ;;  %v2216_v52 = vadd.f32 %v2215_v50, %v2214_v47  ;;  %v2327_v53 = vpop.f32.mrb[3].mxu1 }
 0x10a   : > { %v2328_v54 = vadd.f32 %v2327_v53, %v2326_v49 }
 0x10b   : > { %v1182_v55 = vadd.f32 %v2325_v48, %v1021_v51  ;;  %v1024_v56 = vadd.f32 %v2216_v52, %v3132_v43 }
 0x10d   : > { %v1185_v59 = vadd.f32 %v2328_v54, %v1024_v56  ;;  %v2217_v60 = vpop.f32.mrb[4].mxu0  ;;  %v1308_v63 = vmax.f32 %v1182_v55, 0.0 }
 0x10e   : > { %v2329_v61 = vpop.f32.mrb[4].mxu1  ;;  %v2218_v62 = vpop.f32.mrb[5].mxu0 }
 0x10f   : > { %v1309_v0 = vmax.f32 %v1185_v59, 0.0  ;;  %v2219_v1 = vadd.f32 %v2218_v62, %v2217_v60  ;;  %v2330_v2 = vpop.f32.mrb[5].mxu1  ;;  %v2220_v3 = vpop.f32.mrb[6].mxu0 }
 0x110   : > { %v2331_v5 = vadd.f32 %v2330_v2, %v2329_v61  ;;  %v2332_v6 = vpop.f32.mrb[6].mxu1  ;;  %v2221_v7 = vpop.f32.mrb[7].mxu0 }
 0x111   : > { %v1029_v8 = vadd.f32 %v2219_v1, %v3132_v43  ;;  %v2222_v9 = vadd.f32 %v2221_v7, %v2220_v3  ;;  %v2333_v10 = vpop.f32.mrb[7].mxu1  ;;  %v1340_v11 = vpack.c.bf16 %v1309_v0, %v1308_v63 }
 0x112   : > { %v2334_v12 = vadd.f32 %v2333_v10, %v2332_v6 }
 0x113   : > { %v1190_v13 = vadd.f32 %v2331_v5, %v1029_v8  ;;  %v1032_v14 = vadd.f32 %v2222_v9, %v3132_v43  ;;  %2501 = vmatprep.mubr.bf16.mxu0 %v1340_v11 }
 0x115   : > { %v1193_v16 = vadd.f32 %v2334_v12, %v1032_v14  ;;  %v2223_v17 = vpop.f32.mrb[8].mxu0  ;;  %v1310_v20 = vmax.f32 %v1190_v13, 0.0 }
 0x116   : > { %v2335_v18 = vpop.f32.mrb[8].mxu1  ;;  %v2224_v19 = vpop.f32.mrb[9].mxu0 }
 0x117   : > { %v1311_v21 = vmax.f32 %v1193_v16, 0.0  ;;  %v2225_v22 = vadd.f32 %v2224_v19, %v2223_v17  ;;  %v2336_v23 = vpop.f32.mrb[9].mxu1  ;;  %v2226_v24 = vpop.f32.mrb[10].mxu0 }
 0x118   : > { %v2337_v26 = vadd.f32 %v2336_v23, %v2335_v18  ;;  %v2338_v27 = vpop.f32.mrb[10].mxu1  ;;  %v2227_v28 = vpop.f32.mrb[11].mxu0 }
 0x119   : > { %v1341_v29 = vpack.c.bf16 %v1311_v21, %v1310_v20  ;;  %v1037_v30 = vadd.f32 %v2225_v22, %v3132_v43  ;;  %v2228_v31 = vadd.f32 %v2227_v28, %v2226_v24  ;;  %v2339_v32 = vpop.f32.mrb[11].mxu1 }
 0x11a   : > { %v2340_v33 = vadd.f32 %v2339_v32, %v2338_v27 }
 0x11b   : > { %v1198_v34 = vadd.f32 %v2337_v26, %v1037_v30  ;;  %v1040_v35 = vadd.f32 %v2228_v31, %v3132_v43  ;;  %2502 = vmatmul.mubr.bf16.vlgmr.msra.gmra.mrb[64].mxu0 %v1341_v29 }
 0x11d   : > { %v1201_v37 = vadd.f32 %v2340_v33, %v1040_v35  ;;  %v2229_v38 = vpop.f32.mrb[12].mxu0  ;;  %v1312_v41 = vmax.f32 %v1198_v34, 0.0 }
 0x11e   : > { %v2341_v39 = vpop.f32.mrb[12].mxu1  ;;  %v2230_v40 = vpop.f32.mrb[13].mxu0 }
 0x11f   : > { %v1313_v42 = vmax.f32 %v1201_v37, 0.0  ;;  %v2231_v44 = vadd.f32 %v2230_v40, %v2229_v38  ;;  %v2342_v45 = vpop.f32.mrb[13].mxu1  ;;  %v2232_v46 = vpop.f32.mrb[14].mxu0 }
 0x120   : > { %v2343_v47 = vadd.f32 %v2342_v45, %v2341_v39  ;;  %v2344_v48 = vpop.f32.mrb[14].mxu1  ;;  %v2233_v49 = vpop.f32.mrb[15].mxu0 }
 0x121   : > { %v1045_v50 = vadd.f32 %v2231_v44, %v3132_v43  ;;  %v2234_v51 = vadd.f32 %v2233_v49, %v2232_v46  ;;  %v2345_v52 = vpop.f32.mrb[15].mxu1  ;;  %v1342_v53 = vpack.c.bf16 %v1313_v42, %v1312_v41 }
 0x122   : > { %v2346_v54 = vadd.f32 %v2345_v52, %v2344_v48 }
 0x123   : > { %v1206_v55 = vadd.f32 %v2343_v47, %v1045_v50  ;;  %v1048_v56 = vadd.f32 %v2234_v51, %v3132_v43  ;;  %2505 = vmatprep.mubr.bf16.mxu0 %v1342_v53 }
 0x125   : > { %v1209_v57 = vadd.f32 %v2346_v54, %v1048_v56  ;;  %v2235_v58 = vpop.f32.mrb[16].mxu0  ;;  %v1314_v61 = vmax.f32 %v1206_v55, 0.0 }
 0x126   : > { %v2347_v59 = vpop.f32.mrb[16].mxu1  ;;  %v2236_v60 = vpop.f32.mrb[17].mxu0 }
 0x127   : > { %v1315_v62 = vmax.f32 %v1209_v57, 0.0  ;;  %v2237_v63 = vadd.f32 %v2236_v60, %v2235_v58  ;;  %v2348_v0 = vpop.f32.mrb[17].mxu1  ;;  %v2238_v1 = vpop.f32.mrb[18].mxu0 }
 0x128   : > { %v2349_v2 = vadd.f32 %v2348_v0, %v2347_v59  ;;  %v2350_v3 = vpop.f32.mrb[18].mxu1  ;;  %v2239_v4 = vpop.f32.mrb[19].mxu0 }
 0x129   : > { %v1053_v5 = vadd.f32 %v2237_v63, %v3132_v43  ;;  %v2240_v6 = vadd.f32 %v2239_v4, %v2238_v1  ;;  %v2351_v7 = vpop.f32.mrb[19].mxu1  ;;  %v1343_v8 = vpack.c.bf16 %v1315_v62, %v1314_v61 }
 0x12a   : > { %v2352_v9 = vadd.f32 %v2351_v7, %v2350_v3 }
 0x12b   : > { %v1214_v10 = vadd.f32 %v2349_v2, %v1053_v5  ;;  %v1056_v11 = vadd.f32 %v2240_v6, %v3132_v43  ;;  %2506 = vmatmul.mubr.bf16.gmra.mrb[68].mxu0 %v1343_v8 }
 0x12d   : > { %v1217_v12 = vadd.f32 %v2352_v9, %v1056_v11  ;;  %v2241_v13 = vpop.f32.mrb[20].mxu0  ;;  %v1316_v16 = vmax.f32 %v1214_v10, 0.0 }
 0x12e   : > { %v2353_v14 = vpop.f32.mrb[20].mxu1  ;;  %v2242_v15 = vpop.f32.mrb[21].mxu0 }
 0x12f   : > { %v1317_v17 = vmax.f32 %v1217_v12, 0.0  ;;  %v2243_v18 = vadd.f32 %v2242_v15, %v2241_v13  ;;  %v2354_v19 = vpop.f32.mrb[21].mxu1  ;;  %v2244_v20 = vpop.f32.mrb[22].mxu0 }
 0x130   : > { %v2355_v21 = vadd.f32 %v2354_v19, %v2353_v14  ;;  %v2356_v22 = vpop.f32.mrb[22].mxu1  ;;  %v2245_v23 = vpop.f32.mrb[23].mxu0 }
 0x131   : > { %v1061_v24 = vadd.f32 %v2243_v18, %v3132_v43  ;;  %v2246_v25 = vadd.f32 %v2245_v23, %v2244_v20  ;;  %v2357_v26 = vpop.f32.mrb[23].mxu1  ;;  %v1344_v27 = vpack.c.bf16 %v1317_v17, %v1316_v16 }
 0x132   : > { %v2358_v28 = vadd.f32 %v2357_v26, %v2356_v22 }
 0x133   : > { %v1222_v29 = vadd.f32 %v2355_v21, %v1061_v24  ;;  %v1064_v30 = vadd.f32 %v2246_v25, %v3132_v43  ;;  %2509 = vmatprep.mubr.bf16.mxu0 %v1344_v27 }
 0x135   : > { %v1225_v31 = vadd.f32 %v2358_v28, %v1064_v30  ;;  %v2247_v32 = vpop.f32.mrb[24].mxu0  ;;  %v1318_v35 = vmax.f32 %v1222_v29, 0.0 }
 0x136   : > { %v2359_v33 = vpop.f32.mrb[24].mxu1  ;;  %v2248_v34 = vpop.f32.mrb[25].mxu0 }
 0x137   : > { %v1319_v36 = vmax.f32 %v1225_v31, 0.0  ;;  %v2249_v37 = vadd.f32 %v2248_v34, %v2247_v32  ;;  %v2360_v38 = vpop.f32.mrb[25].mxu1  ;;  %v2250_v39 = vpop.f32.mrb[26].mxu0 }
 0x138   : > { %v2361_v40 = vadd.f32 %v2360_v38, %v2359_v33  ;;  %v2362_v41 = vpop.f32.mrb[26].mxu1  ;;  %v2251_v42 = vpop.f32.mrb[27].mxu0 }
 0x139   : > { %v1069_v44 = vadd.f32 %v2249_v37, %v3132_v43  ;;  %v2252_v45 = vadd.f32 %v2251_v42, %v2250_v39  ;;  %v2363_v46 = vpop.f32.mrb[27].mxu1  ;;  %v1345_v47 = vpack.c.bf16 %v1319_v36, %v1318_v35 }
 0x13a   : > { %v2364_v48 = vadd.f32 %v2363_v46, %v2362_v41 }
 0x13b   : > { %v1230_v49 = vadd.f32 %v2361_v40, %v1069_v44  ;;  %v1072_v50 = vadd.f32 %v2252_v45, %v3132_v43  ;;  %2510 = vmatmul.mubr.bf16.gmra.mrb[72].mxu0 %v1345_v47 }
 0x13d   : > { %v1233_v51 = vadd.f32 %v2364_v48, %v1072_v50  ;;  %v2253_v52 = vpop.f32.mrb[28].mxu0  ;;  %v1320_v55 = vmax.f32 %v1230_v49, 0.0 }
 0x13e   : > { %v2365_v53 = vpop.f32.mrb[28].mxu1  ;;  %v2254_v54 = vpop.f32.mrb[29].mxu0 }
 0x13f   : > { %v1321_v56 = vmax.f32 %v1233_v51, 0.0  ;;  %v2255_v57 = vadd.f32 %v2254_v54, %v2253_v52  ;;  %v2366_v58 = vpop.f32.mrb[29].mxu1  ;;  %v2256_v59 = vpop.f32.mrb[30].mxu0 }
 0x140   : > { %v2367_v60 = vadd.f32 %v2366_v58, %v2365_v53  ;;  %v2368_v61 = vpop.f32.mrb[30].mxu1  ;;  %v2257_v62 = vpop.f32.mrb[31].mxu0 }
 0x141   : > { %v1077_v63 = vadd.f32 %v2255_v57, %v3132_v43  ;;  %v2258_v0 = vadd.f32 %v2257_v62, %v2256_v59  ;;  %v2369_v1 = vpop.f32.mrb[31].mxu1  ;;  %v1346_v2 = vpack.c.bf16 %v1321_v56, %v1320_v55 }
 0x142   : > { %v2370_v3 = vadd.f32 %v2369_v1, %v2368_v61 }
 0x143   : > { %v1238_v4 = vadd.f32 %v2367_v60, %v1077_v63  ;;  %v1080_v5 = vadd.f32 %v2258_v0, %v3132_v43  ;;  %2513 = vmatprep.mubr.bf16.mxu0 %v1346_v2 }
 0x145   : > { %v1241_v6 = vadd.f32 %v2370_v3, %v1080_v5  ;;  %v2259_v7 = vpop.f32.mrb[32].mxu0  ;;  %v1322_v10 = vmax.f32 %v1238_v4, 0.0 }
 0x146   : > { %v2371_v8 = vpop.f32.mrb[32].mxu1  ;;  %v2260_v9 = vpop.f32.mrb[33].mxu0 }
 0x147   : > { %v1323_v11 = vmax.f32 %v1241_v6, 0.0  ;;  %v2261_v12 = vadd.f32 %v2260_v9, %v2259_v7  ;;  %v2372_v13 = vpop.f32.mrb[33].mxu1  ;;  %v2262_v14 = vpop.f32.mrb[34].mxu0 }
 0x148   : > { %v2373_v15 = vadd.f32 %v2372_v13, %v2371_v8  ;;  %v2374_v16 = vpop.f32.mrb[34].mxu1  ;;  %v2263_v17 = vpop.f32.mrb[35].mxu0 }
 0x149   : > { %v1085_v18 = vadd.f32 %v2261_v12, %v3132_v43  ;;  %v2264_v19 = vadd.f32 %v2263_v17, %v2262_v14  ;;  %v2375_v20 = vpop.f32.mrb[35].mxu1  ;;  %v1347_v21 = vpack.c.bf16 %v1323_v11, %v1322_v10 }
 0x14a   : > { %v2376_v22 = vadd.f32 %v2375_v20, %v2374_v16 }
 0x14b   : > { %v1246_v23 = vadd.f32 %v2373_v15, %v1085_v18  ;;  %v1088_v24 = vadd.f32 %v2264_v19, %v3132_v43  ;;  %2514 = vmatmul.mubr.bf16.gmra.mrb[76].mxu0 %v1347_v21 }
 0x14d   : > { %v1249_v25 = vadd.f32 %v2376_v22, %v1088_v24  ;;  %v2265_v26 = vpop.f32.mrb[36].mxu0  ;;  %v1324_v29 = vmax.f32 %v1246_v23, 0.0 }
 0x14e   : > { %v2377_v27 = vpop.f32.mrb[36].mxu1  ;;  %v2266_v28 = vpop.f32.mrb[37].mxu0 }
 0x14f   : > { %v1325_v30 = vmax.f32 %v1249_v25, 0.0  ;;  %v2267_v31 = vadd.f32 %v2266_v28, %v2265_v26  ;;  %v2378_v32 = vpop.f32.mrb[37].mxu1  ;;  %v2268_v33 = vpop.f32.mrb[38].mxu0 }
 0x150   : > { %v2379_v34 = vadd.f32 %v2378_v32, %v2377_v27  ;;  %v2380_v35 = vpop.f32.mrb[38].mxu1  ;;  %v2269_v36 = vpop.f32.mrb[39].mxu0 }
 0x151   : > { %v1093_v37 = vadd.f32 %v2267_v31, %v3132_v43  ;;  %v2270_v38 = vadd.f32 %v2269_v36, %v2268_v33  ;;  %v2381_v39 = vpop.f32.mrb[39].mxu1  ;;  %v1348_v40 = vpack.c.bf16 %v1325_v30, %v1324_v29 }
 0x152   : > { %v2382_v41 = vadd.f32 %v2381_v39, %v2380_v35 }
 0x153   : > { %v1254_v42 = vadd.f32 %v2379_v34, %v1093_v37  ;;  %v1096_v44 = vadd.f32 %v2270_v38, %v3132_v43  ;;  %2517 = vmatprep.mubr.bf16.mxu0 %v1348_v40 }
 0x155   : > { %v1257_v45 = vadd.f32 %v2382_v41, %v1096_v44  ;;  %v2271_v46 = vpop.f32.mrb[40].mxu0  ;;  %v1326_v49 = vmax.f32 %v1254_v42, 0.0 }
 0x156   : > { %v2383_v47 = vpop.f32.mrb[40].mxu1  ;;  %v2272_v48 = vpop.f32.mrb[41].mxu0 }
 0x157   : > { %v1327_v50 = vmax.f32 %v1257_v45, 0.0  ;;  %v2273_v51 = vadd.f32 %v2272_v48, %v2271_v46  ;;  %v2384_v52 = vpop.f32.mrb[41].mxu1  ;;  %v2274_v53 = vpop.f32.mrb[42].mxu0 }
 0x158   : > { %v2385_v54 = vadd.f32 %v2384_v52, %v2383_v47  ;;  %v2386_v55 = vpop.f32.mrb[42].mxu1  ;;  %v2275_v56 = vpop.f32.mrb[43].mxu0 }
 0x159   : > { %v1101_v57 = vadd.f32 %v2273_v51, %v3132_v43  ;;  %v2276_v58 = vadd.f32 %v2275_v56, %v2274_v53  ;;  %v2387_v59 = vpop.f32.mrb[43].mxu1  ;;  %v1349_v60 = vpack.c.bf16 %v1327_v50, %v1326_v49  ;;  %v2765_v51 = vld [vmem:[%s3341_s5 + $0x30] sm:$0xff]  }
 0x15a   : > { %v2388_v61 = vadd.f32 %v2387_v59, %v2386_v55  ;;  %2545 = vmatprep.subr.bf16.mxu1 %v2765_v51  ;;  %v2766_v59 = vld [vmem:[%s3341_s5 + $0x38] sm:$0xff]  }
 0x15b   : > { %v1262_v62 = vadd.f32 %v2385_v54, %v1101_v57  ;;  %v1104_v63 = vadd.f32 %v2276_v58, %v3132_v43  ;;  %2518 = vmatmul.mubr.bf16.gmra.mrb[80].mxu0 %v1349_v60  ;;  %2546 = vmatpush3.bf16.msra.mxu1 %v2765_v51 }
 0x15c   : > { %2547 = vmatprep.subr.bf16.mxu1 %v2766_v59 }
 0x15d   : > { %v1265_v0 = vadd.f32 %v2388_v61, %v1104_v63  ;;  %v2277_v1 = vpop.f32.mrb[44].mxu0  ;;  %v1328_v4 = vmax.f32 %v1262_v62, 0.0 }
 0x15e   : > { %v2389_v2 = vpop.f32.mrb[44].mxu1  ;;  %v2278_v3 = vpop.f32.mrb[45].mxu0 }
 0x15f   : > { %v1329_v5 = vmax.f32 %v1265_v0, 0.0  ;;  %v2279_v6 = vadd.f32 %v2278_v3, %v2277_v1  ;;  %v2390_v7 = vpop.f32.mrb[45].mxu1  ;;  %v2280_v8 = vpop.f32.mrb[46].mxu0  ;;  %2548 = vmatpush3.bf16.msra.mxu1 %v2766_v59 }
 0x160   : > { %v2391_v9 = vadd.f32 %v2390_v7, %v2389_v2  ;;  %v2392_v10 = vpop.f32.mrb[46].mxu1  ;;  %v2281_v11 = vpop.f32.mrb[47].mxu0 }
 0x161   : > { %v1109_v12 = vadd.f32 %v2279_v6, %v3132_v43  ;;  %v2282_v13 = vadd.f32 %v2281_v11, %v2280_v8  ;;  %v2393_v14 = vpop.f32.mrb[47].mxu1  ;;  %v1350_v15 = vpack.c.bf16 %v1329_v5, %v1328_v4 }
 0x162   : > { %v2394_v16 = vadd.f32 %v2393_v14, %v2392_v10 }
 0x163   : > { %v1270_v17 = vadd.f32 %v2391_v9, %v1109_v12  ;;  %v1112_v18 = vadd.f32 %v2282_v13, %v3132_v43  ;;  %2521 = vmatprep.mubr.bf16.mxu0 %v1350_v15 }
 0x165   : > { %v1273_v19 = vadd.f32 %v2394_v16, %v1112_v18  ;;  %v2283_v20 = vpop.f32.mrb[48].mxu0  ;;  %v1330_v23 = vmax.f32 %v1270_v17, 0.0 }
 0x166   : > { %v2395_v21 = vpop.f32.mrb[48].mxu1  ;;  %v2284_v22 = vpop.f32.mrb[49].mxu0 }
 0x167   : > { %v1331_v24 = vmax.f32 %v1273_v19, 0.0  ;;  %v2285_v25 = vadd.f32 %v2284_v22, %v2283_v20  ;;  %v2396_v26 = vpop.f32.mrb[49].mxu1  ;;  %v2286_v27 = vpop.f32.mrb[50].mxu0 }
 0x168   : > { %v2397_v28 = vadd.f32 %v2396_v26, %v2395_v21  ;;  %v2398_v29 = vpop.f32.mrb[50].mxu1  ;;  %v2287_v30 = vpop.f32.mrb[51].mxu0 }
 0x169   : > { %v1117_v31 = vadd.f32 %v2285_v25, %v3132_v43  ;;  %v2288_v32 = vadd.f32 %v2287_v30, %v2286_v27  ;;  %v2399_v33 = vpop.f32.mrb[51].mxu1  ;;  %v1351_v34 = vpack.c.bf16 %v1331_v24, %v1330_v23 }
 0x16a   : > { %v2400_v35 = vadd.f32 %v2399_v33, %v2398_v29 }
 0x16b   : > { %v1278_v36 = vadd.f32 %v2397_v28, %v1117_v31  ;;  %v1120_v37 = vadd.f32 %v2288_v32, %v3132_v43  ;;  %2522 = vmatmul.mubr.bf16.gmra.mrb[84].mxu0 %v1351_v34 }
 0x16d   : > { %v1281_v38 = vadd.f32 %v2400_v35, %v1120_v37  ;;  %v2289_v39 = vpop.f32.mrb[52].mxu0  ;;  %v1332_v42 = vmax.f32 %v1278_v36, 0.0 }
 0x16e   : > { %v2401_v40 = vpop.f32.mrb[52].mxu1  ;;  %v2290_v41 = vpop.f32.mrb[53].mxu0 }
 0x16f   : > { %v1333_v44 = vmax.f32 %v1281_v38, 0.0  ;;  %v2291_v45 = vadd.f32 %v2290_v41, %v2289_v39  ;;  %v2402_v46 = vpop.f32.mrb[53].mxu1  ;;  %v2292_v47 = vpop.f32.mrb[54].mxu0  ;;  %v3193_v38 = vld [vmem:[%s3340_s4] ss:$0 sm:$0xff] }
 0x170   : > { %v2403_v48 = vadd.f32 %v2402_v46, %v2401_v40  ;;  %v2404_v49 = vpop.f32.mrb[54].mxu1  ;;  %v2293_v50 = vpop.f32.mrb[55].mxu0 }
 0x171   : > { %v1125_v52 = vadd.f32 %v2291_v45, %v3132_v43  ;;  %v2294_v53 = vadd.f32 %v2293_v50, %v2292_v47  ;;  %v2405_v54 = vpop.f32.mrb[55].mxu1  ;;  %v1352_v55 = vpack.c.bf16 %v1333_v44, %v1332_v42 }
 0x172   : > { %v2406_v56 = vadd.f32 %v2405_v54, %v2404_v49 }
 0x173   : > { %v1286_v57 = vadd.f32 %v2403_v48, %v1125_v52  ;;  %v1128_v58 = vadd.f32 %v2294_v53, %v3132_v43  ;;  %2525 = vmatprep.mubr.bf16.mxu0 %v1352_v55 }
 0x175   : > { %v1289_v60 = vadd.f32 %v2406_v56, %v1128_v58  ;;  %v2295_v61 = vpop.f32.mrb[56].mxu0  ;;  %v1334_v0 = vmax.f32 %v1286_v57, 0.0 }
 0x176   : > { %v2407_v62 = vpop.f32.mrb[56].mxu1  ;;  %v2296_v63 = vpop.f32.mrb[57].mxu0 }
 0x177   : > { %v1335_v1 = vmax.f32 %v1289_v60, 0.0  ;;  %v2297_v2 = vadd.f32 %v2296_v63, %v2295_v61  ;;  %v2408_v3 = vpop.f32.mrb[57].mxu1  ;;  %v2298_v4 = vpop.f32.mrb[58].mxu0 }
 0x178   : > { %v2409_v5 = vadd.f32 %v2408_v3, %v2407_v62  ;;  %v2410_v6 = vpop.f32.mrb[58].mxu1  ;;  %v2299_v7 = vpop.f32.mrb[59].mxu0 }
 0x179   : > { %v1133_v8 = vadd.f32 %v2297_v2, %v3132_v43  ;;  %v2300_v9 = vadd.f32 %v2299_v7, %v2298_v4  ;;  %v2411_v10 = vpop.f32.mrb[59].mxu1  ;;  %v1353_v11 = vpack.c.bf16 %v1335_v1, %v1334_v0 }
 0x17a   : > { %v2412_v12 = vadd.f32 %v2411_v10, %v2410_v6 }
 0x17b   : > { %v1294_v13 = vadd.f32 %v2409_v5, %v1133_v8  ;;  %v1136_v14 = vadd.f32 %v2300_v9, %v3132_v43  ;;  %2526 = vmatmul.mubr.bf16.gmra.mrb[88].mxu0 %v1353_v11 }
 0x17d   : > { %v1297_v15 = vadd.f32 %v2412_v12, %v1136_v14  ;;  %v2301_v16 = vpop.f32.mrb[60].mxu0  ;;  %v1336_v19 = vmax.f32 %v1294_v13, 0.0 }
 0x17e   : > { %v2413_v17 = vpop.f32.mrb[60].mxu1  ;;  %v2302_v18 = vpop.f32.mrb[61].mxu0 }
 0x17f   : > { %v1337_v20 = vmax.f32 %v1297_v15, 0.0  ;;  %v2303_v21 = vadd.f32 %v2302_v18, %v2301_v16  ;;  %v2414_v22 = vpop.f32.mrb[61].mxu1  ;;  %v2304_v23 = vpop.f32.mrb[62].mxu0 }
 0x180   : > { %v2415_v24 = vadd.f32 %v2414_v22, %v2413_v17  ;;  %v2416_v25 = vpop.f32.mrb[62].mxu1  ;;  %v2305_v26 = vpop.f32.mrb[63].mxu0 }
 0x181   : > { %v1141_v27 = vadd.f32 %v2303_v21, %v3132_v43  ;;  %v2306_v28 = vadd.f32 %v2305_v26, %v2304_v23  ;;  %v2417_v29 = vpop.f32.mrb[63].mxu1  ;;  %v1354_v30 = vpack.c.bf16 %v1337_v20, %v1336_v19 }
 0x182   : > { %v2418_v31 = vadd.f32 %v2417_v29, %v2416_v25 }
 0x183   : > { %v1302_v32 = vadd.f32 %v2415_v24, %v1141_v27  ;;  %v1144_v33 = vadd.f32 %v2306_v28, %v3132_v43  ;;  %2529 = vmatprep.mubr.bf16.mxu0 %v1354_v30 }
 0x185   : > { %v1305_v34 = vadd.f32 %v2418_v31, %v1144_v33  ;;  %v1338_v35 = vmax.f32 %v1302_v32, 0.0 }
 0x187   : > { %v1339_v36 = vmax.f32 %v1305_v34, 0.0 }
 0x189   : > { %v1355_v37 = vpack.c.bf16 %v1339_v36, %v1338_v35 }
 0x18b   : > { %2530 = vmatmul.mubr.bf16.gmra.mrb[92].mxu0 %v1355_v37 }
 0x1ee   : > { %v2503_v39 = vpop.f32.mrb[64].mxu0 }
 0x1ef   : > { %v1470_v40 = vadd.f32 %v2503_v39, %v3193_v38  ;;  %v1461_v41 = vpop.f32.mrb[65].mxu0 }
 0x1f0   : > { %v1462_v42 = vadd.f32 %v3193_v38, %v1461_v41  ;;  %v2504_v44 = vpop.f32.mrb[66].mxu0 }
 0x1f1   : > { %v1473_v43 = vadd.f32 %v2504_v44, %v3193_v38  ;;  %v1464_v45 = vpop.f32.mrb[67].mxu0  ;;  %v1590_v47 = vmax.f32 %v1470_v40, 0.0 }
 0x1f2   : > { %v1465_v46 = vadd.f32 %v3193_v38, %v1464_v45  ;;  %v1588_v49 = vmax.f32 %v1462_v42, 0.0 }
 0x1f3   : > { %v1591_v48 = vmax.f32 %v1473_v43, 0.0 }
 0x1f4   : > { %v1589_v50 = vmax.f32 %v1465_v46, 0.0 }
 0x1f5   : > { %v1621_v51 = vpack.c.bf16 %v1591_v48, %v1590_v47 }
 0x1f6   : > { %v1620_v52 = vpack.c.bf16 %v1589_v50, %v1588_v49 }
 0x1f8   : > { %2549 = vmatprep.mubr.bf16.mxu1 %v1620_v52 }
 0x1f9   : > { %2550 = vmatmul.mubr.bf16.vlgmr.msra.gmra.mrb[64].mxu1 %v1621_v51 }
 0x1fe   : > { %v2507_v53 = vpop.f32.mrb[68].mxu0 }
 0x1ff   : > { %v1486_v54 = vadd.f32 %v2507_v53, %v3193_v38  ;;  %v1477_v55 = vpop.f32.mrb[69].mxu0 }
 0x200   : > { %v1478_v56 = vadd.f32 %v3193_v38, %v1477_v55  ;;  %v2508_v57 = vpop.f32.mrb[70].mxu0 }
 0x201   : > { %v1489_v58 = vadd.f32 %v2508_v57, %v3193_v38  ;;  %v1480_v59 = vpop.f32.mrb[71].mxu0  ;;  %v1594_v61 = vmax.f32 %v1486_v54, 0.0 }
 0x202   : > { %v1481_v60 = vadd.f32 %v3193_v38, %v1480_v59  ;;  %v1592_v63 = vmax.f32 %v1478_v56, 0.0 }
 0x203   : > { %v1595_v62 = vmax.f32 %v1489_v58, 0.0 }
 0x204   : > { %v1593_v0 = vmax.f32 %v1481_v60, 0.0 }
 0x205   : > { %v1623_v1 = vpack.c.bf16 %v1595_v62, %v1594_v61 }
 0x206   : > { %v1622_v2 = vpack.c.bf16 %v1593_v0, %v1592_v63 }
 0x208   : > { %2553 = vmatprep.mubr.bf16.mxu1 %v1622_v2 }
 0x209   : > { %2554 = vmatmul.mubr.bf16.gmra.mrb[68].mxu1 %v1623_v1 }
 0x20e   : > { %v2511_v3 = vpop.f32.mrb[72].mxu0 }
 0x20f   : > { %v1502_v4 = vadd.f32 %v2511_v3, %v3193_v38  ;;  %v1493_v5 = vpop.f32.mrb[73].mxu0 }
 0x210   : > { %v1494_v6 = vadd.f32 %v3193_v38, %v1493_v5  ;;  %v2512_v7 = vpop.f32.mrb[74].mxu0 }
 0x211   : > { %v1505_v8 = vadd.f32 %v2512_v7, %v3193_v38  ;;  %v1496_v9 = vpop.f32.mrb[75].mxu0  ;;  %v1598_v11 = vmax.f32 %v1502_v4, 0.0 }
 0x212   : > { %v1497_v10 = vadd.f32 %v3193_v38, %v1496_v9  ;;  %v1596_v13 = vmax.f32 %v1494_v6, 0.0 }
 0x213   : > { %v1599_v12 = vmax.f32 %v1505_v8, 0.0 }
 0x214   : > { %v1597_v14 = vmax.f32 %v1497_v10, 0.0 }
 0x215   : > { %v1625_v15 = vpack.c.bf16 %v1599_v12, %v1598_v11 }
 0x216   : > { %v1624_v16 = vpack.c.bf16 %v1597_v14, %v1596_v13 }
 0x218   : > { %2557 = vmatprep.mubr.bf16.mxu1 %v1624_v16 }
 0x219   : > { %2558 = vmatmul.mubr.bf16.gmra.mrb[72].mxu1 %v1625_v15 }
 0x21e   : > { %v2515_v17 = vpop.f32.mrb[76].mxu0 }
 0x21f   : > { %v1518_v18 = vadd.f32 %v2515_v17, %v3193_v38  ;;  %v1509_v19 = vpop.f32.mrb[77].mxu0 }
 0x220   : > { %v1510_v20 = vadd.f32 %v3193_v38, %v1509_v19  ;;  %v2516_v21 = vpop.f32.mrb[78].mxu0 }
 0x221   : > { %v1521_v22 = vadd.f32 %v2516_v21, %v3193_v38  ;;  %v1512_v23 = vpop.f32.mrb[79].mxu0  ;;  %v1602_v25 = vmax.f32 %v1518_v18, 0.0 }
 0x222   : > { %v1513_v24 = vadd.f32 %v3193_v38, %v1512_v23  ;;  %v1600_v27 = vmax.f32 %v1510_v20, 0.0 }
 0x223   : > { %v1603_v26 = vmax.f32 %v1521_v22, 0.0 }
 0x224   : > { %v1601_v28 = vmax.f32 %v1513_v24, 0.0  ;;  %v3230_v24 = vld [vmem:[%s3342_s6] ss:$0 sm:$0xff] }
 0x225   : > { %v1627_v29 = vpack.c.bf16 %v1603_v26, %v1602_v25 }
 0x226   : > { %v1626_v30 = vpack.c.bf16 %v1601_v28, %v1600_v27 }
 0x228   : > { %2561 = vmatprep.mubr.bf16.mxu1 %v1626_v30 }
 0x229   : > { %2562 = vmatmul.mubr.bf16.gmra.mrb[76].mxu1 %v1627_v29 }
 0x22e   : > { %v2519_v31 = vpop.f32.mrb[80].mxu0 }
 0x22f   : > { %v1534_v32 = vadd.f32 %v2519_v31, %v3193_v38  ;;  %v1525_v33 = vpop.f32.mrb[81].mxu0  ;;  %v3238_v31 = vld [vmem:[%s3343_s7] sm:$0x1] }
 0x230   : > { %v1526_v34 = vadd.f32 %v3193_v38, %v1525_v33  ;;  %v2520_v35 = vpop.f32.mrb[82].mxu0  ;;  %2483 = vmatprep.mubr.bf16.mxu0 %v3238_v31 }
 0x231   : > { %v1537_v36 = vadd.f32 %v2520_v35, %v3193_v38  ;;  %v1528_v37 = vpop.f32.mrb[83].mxu0  ;;  %v1606_v40 = vmax.f32 %v1534_v32, 0.0 }
 0x232   : > { %v1529_v39 = vadd.f32 %v3193_v38, %v1528_v37  ;;  %v1604_v42 = vmax.f32 %v1526_v34, 0.0 }
 0x233   : > { %v1607_v41 = vmax.f32 %v1537_v36, 0.0 }
 0x234   : > { %v1605_v44 = vmax.f32 %v1529_v39, 0.0 }
 0x235   : > { %v1629_v43 = vpack.c.bf16 %v1607_v41, %v1606_v40  ;;  %v1917_v40 = vld [vmem:[#allocation2] sm:$0x1]  ;;  %v2831_v41 = vmov 0  }
 0x236   : > { %v1628_v45 = vpack.c.bf16 %v1605_v44, %v1604_v42  ;;  %2622 = vset.pattern.permute.xlu0 %v2831_v41 }
 0x237   : > { %1920 = vperm.xlu0 %2622, %v1917_v40  }
 0x238   : > { %2565 = vmatprep.mubr.bf16.mxu1 %v1628_v45 }
 0x239   : > { %2566 = vmatmul.mubr.bf16.gmra.mrb[80].mxu1 %v1629_v43 }
 0x23e   : > { %v2523_v46 = vpop.f32.mrb[84].mxu0 }
 0x23f   : > { %v1550_v47 = vadd.f32 %v2523_v46, %v3193_v38  ;;  %v1541_v48 = vpop.f32.mrb[85].mxu0 }
 0x240   : > { %v1542_v49 = vadd.f32 %v3193_v38, %v1541_v48  ;;  %v2524_v50 = vpop.f32.mrb[86].mxu0 }
 0x241   : > { %v1553_v51 = vadd.f32 %v2524_v50, %v3193_v38  ;;  %v1544_v52 = vpop.f32.mrb[87].mxu0  ;;  %v1610_v54 = vmax.f32 %v1550_v47, 0.0 }
 0x242   : > { %v1545_v53 = vadd.f32 %v3193_v38, %v1544_v52  ;;  %v1608_v56 = vmax.f32 %v1542_v49, 0.0 }
 0x243   : > { %v1611_v55 = vmax.f32 %v1553_v51, 0.0 }
 0x244   : > { %v1609_v57 = vmax.f32 %v1545_v53, 0.0 }
 0x245   : > { %v1631_v58 = vpack.c.bf16 %v1611_v55, %v1610_v54 }
 0x246   : > { %v1630_v59 = vpack.c.bf16 %v1609_v57, %v1608_v56 }
 0x248   : > { %2569 = vmatprep.mubr.bf16.mxu1 %v1630_v59 }
 0x249   : > { %2570 = vmatmul.mubr.bf16.gmra.mrb[84].mxu1 %v1631_v58 }
 0x24e   : > { %v2527_v60 = vpop.f32.mrb[88].mxu0 }
 0x24f   : > { %v1566_v61 = vadd.f32 %v2527_v60, %v3193_v38  ;;  %v1557_v62 = vpop.f32.mrb[89].mxu0 }
 0x250   : > { %v1558_v63 = vadd.f32 %v3193_v38, %v1557_v62  ;;  %v2528_v0 = vpop.f32.mrb[90].mxu0 }
 0x251   : > { %v1569_v1 = vadd.f32 %v2528_v0, %v3193_v38  ;;  %v1560_v2 = vpop.f32.mrb[91].mxu0  ;;  %v1614_v4 = vmax.f32 %v1566_v61, 0.0 }
 0x252   : > { %v1561_v3 = vadd.f32 %v3193_v38, %v1560_v2  ;;  %v1612_v6 = vmax.f32 %v1558_v63, 0.0 }
 0x253   : > { %v1615_v5 = vmax.f32 %v1569_v1, 0.0 }
 0x254   : > { %v1613_v7 = vmax.f32 %v1561_v3, 0.0 }
 0x255   : > { %v1633_v8 = vpack.c.bf16 %v1615_v5, %v1614_v4 }
 0x256   : > { %v1632_v9 = vpack.c.bf16 %v1613_v7, %v1612_v6 }
 0x258   : > { %2573 = vmatprep.mubr.bf16.mxu1 %v1632_v9 }
 0x259   : > { %2574 = vmatmul.mubr.bf16.gmra.mrb[88].mxu1 %v1633_v8 }
 0x25e   : > { %v2531_v10 = vpop.f32.mrb[92].mxu0 }
 0x25f   : > { %v1582_v11 = vadd.f32 %v2531_v10, %v3193_v38  ;;  %v1573_v12 = vpop.f32.mrb[93].mxu0 }
 0x260   : > { %v1574_v13 = vadd.f32 %v3193_v38, %v1573_v12  ;;  %v2532_v14 = vpop.f32.mrb[94].mxu0 }
 0x261   : > { %v1585_v15 = vadd.f32 %v2532_v14, %v3193_v38  ;;  %v1576_v16 = vpop.f32.mrb[95].mxu0  ;;  %v1618_v18 = vmax.f32 %v1582_v11, 0.0 }
 0x262   : > { %v1577_v17 = vadd.f32 %v3193_v38, %v1576_v16  ;;  %v1616_v20 = vmax.f32 %v1574_v13, 0.0 }
 0x263   : > { %v1619_v19 = vmax.f32 %v1585_v15, 0.0 }
 0x264   : > { %v1617_v21 = vmax.f32 %v1577_v17, 0.0 }
 0x265   : > { %v1635_v22 = vpack.c.bf16 %v1619_v19, %v1618_v18 }
 0x266   : > { %v1634_v23 = vpack.c.bf16 %v1617_v21, %v1616_v20 }
 0x268   : > { %2577 = vmatprep.mubr.bf16.mxu1 %v1634_v23 }
 0x269   : > { %2578 = vmatmul.mubr.bf16.gmra.mrb[92].mxu1 %v1635_v22 }
 0x2cc   : > { %v2551_v25 = vpop.f32.mrb[64].mxu1 }
 0x2cd   : > { %v1750_v26 = vadd.f32 %v2551_v25, %v3230_v24  ;;  %v1741_v27 = vpop.f32.mrb[65].mxu1 }
 0x2ce   : > { %v1742_v28 = vadd.f32 %v3230_v24, %v1741_v27  ;;  %v2552_v38 = vpop.f32.mrb[66].mxu1 }
 0x2cf   : > { %v1753_v29 = vadd.f32 %v2552_v38, %v3230_v24  ;;  %v1744_v30 = vpop.f32.mrb[67].mxu1  ;;  %v1870_v33 = vmax.f32 %v1750_v26, 0.0 }
 0x2d0   : > { %v1745_v32 = vadd.f32 %v3230_v24, %v1744_v30  ;;  %v1868_v35 = vmax.f32 %v1742_v28, 0.0 }
 0x2d1   : > { %v1871_v34 = vmax.f32 %v1753_v29, 0.0 }
 0x2d2   : > { %v1869_v36 = vmax.f32 %v1745_v32, 0.0 }
 0x2d3   : > { %v3242_v37 = vpack.c.bf16 %v1871_v34, %v1870_v33 }
 0x2d4   : > { %v1901_v39 = vpack.c.bf16 %v1869_v36, %v1868_v35 }
 0x2dc   : > { %v2555_v42 = vpop.f32.mrb[68].mxu1 }
 0x2dd   : > { %v1766_v44 = vadd.f32 %v2555_v42, %v3230_v24  ;;  %v1757_v43 = vpop.f32.mrb[69].mxu1 }
 0x2de   : > { %v1758_v45 = vadd.f32 %v3230_v24, %v1757_v43  ;;  %v2556_v46 = vpop.f32.mrb[70].mxu1 }
 0x2df   : > { %v1769_v47 = vadd.f32 %v2556_v46, %v3230_v24  ;;  %v1760_v48 = vpop.f32.mrb[71].mxu1  ;;  %v1874_v50 = vmax.f32 %v1766_v44, 0.0 }
 0x2e0   : > { %v1761_v49 = vadd.f32 %v3230_v24, %v1760_v48  ;;  %v1872_v52 = vmax.f32 %v1758_v45, 0.0 }
 0x2e1   : > { %v1875_v51 = vmax.f32 %v1769_v47, 0.0 }
 0x2e2   : > { %v1873_v53 = vmax.f32 %v1761_v49, 0.0 }
 0x2e3   : > { %v3248_v54 = vpack.c.bf16 %v1875_v51, %v1874_v50 }
 0x2e4   : > { %v1903_v55 = vpack.c.bf16 %v1873_v53, %v1872_v52 }
 0x2ec   : > { %v2559_v56 = vpop.f32.mrb[72].mxu1 }
 0x2ed   : > { %v1782_v57 = vadd.f32 %v2559_v56, %v3230_v24  ;;  %v1773_v58 = vpop.f32.mrb[73].mxu1 }
 0x2ee   : > { %v1774_v59 = vadd.f32 %v3230_v24, %v1773_v58  ;;  %v2560_v60 = vpop.f32.mrb[74].mxu1 }
 0x2ef   : > { %v1785_v61 = vadd.f32 %v2560_v60, %v3230_v24  ;;  %v1776_v62 = vpop.f32.mrb[75].mxu1  ;;  %v1878_v0 = vmax.f32 %v1782_v57, 0.0 }
 0x2f0   : > { %v1777_v63 = vadd.f32 %v3230_v24, %v1776_v62  ;;  %v1876_v2 = vmax.f32 %v1774_v59, 0.0 }
 0x2f1   : > { %v1879_v1 = vmax.f32 %v1785_v61, 0.0 }
 0x2f2   : > { %v1877_v3 = vmax.f32 %v1777_v63, 0.0 }
 0x2f3   : > { %v3254_v4 = vpack.c.bf16 %v1879_v1, %v1878_v0 }
 0x2f4   : > { %v3256_v5 = vpack.c.bf16 %v1877_v3, %v1876_v2 }
 0x2fc   : > { %v2563_v6 = vpop.f32.mrb[76].mxu1 }
 0x2fd   : > { %v1798_v7 = vadd.f32 %v2563_v6, %v3230_v24  ;;  %v1789_v8 = vpop.f32.mrb[77].mxu1 }
 0x2fe   : > { %v1790_v9 = vadd.f32 %v3230_v24, %v1789_v8  ;;  %v2564_v10 = vpop.f32.mrb[78].mxu1 }
 0x2ff   : > { %v1801_v11 = vadd.f32 %v2564_v10, %v3230_v24  ;;  %v1792_v12 = vpop.f32.mrb[79].mxu1  ;;  %v1882_v14 = vmax.f32 %v1798_v7, 0.0 }
 0x300   : > { %v1793_v13 = vadd.f32 %v3230_v24, %v1792_v12  ;;  %v1880_v16 = vmax.f32 %v1790_v9, 0.0 }
 0x301   : > { %v1883_v15 = vmax.f32 %v1801_v11, 0.0 }
 0x302   : > { %v1881_v17 = vmax.f32 %v1793_v13, 0.0 }
 0x303   : > { %v3262_v18 = vpack.c.bf16 %v1883_v15, %v1882_v14  ;;  %v1923_v15 = vlaneseq }
 0x304   : > { %v3264_v19 = vpack.c.bf16 %v1881_v17, %v1880_v16  ;;  %v1921_v17 = vpop.permute.xlu0 %1920 }
 0x305   : > { %v1924_v16 = vshrl.u32 %v1923_v15, 7  ;;  %vm1988_vm0 = vcmp.lt.s32.totalorder %v1923_v15, 256 }
 0x30c   : > { %v2567_v20 = vpop.f32.mrb[80].mxu1 }
 0x30d   : > { %v1814_v21 = vadd.f32 %v2567_v20, %v3230_v24  ;;  %v1805_v22 = vpop.f32.mrb[81].mxu1 }
 0x30e   : > { %v1806_v23 = vadd.f32 %v3230_v24, %v1805_v22  ;;  %v2568_v25 = vpop.f32.mrb[82].mxu1 }
 0x30f   : > { %v1817_v26 = vadd.f32 %v2568_v25, %v3230_v24  ;;  %v1808_v27 = vpop.f32.mrb[83].mxu1  ;;  %v1886_v38 = vmax.f32 %v1814_v21, 0.0 }
 0x310   : > { %v1809_v28 = vadd.f32 %v3230_v24, %v1808_v27  ;;  %v1884_v30 = vmax.f32 %v1806_v23, 0.0 }
 0x311   : > { %v1887_v29 = vmax.f32 %v1817_v26, 0.0 }
 0x312   : > { %v1885_v32 = vmax.f32 %v1809_v28, 0.0 }
 0x313   : > { %v1910_v33 = vpack.c.bf16 %v1887_v29, %v1886_v38 }
 0x314   : > { %v1909_v34 = vpack.c.bf16 %v1885_v32, %v1884_v30 }
 0x316   : > { %2467 = vmatprep.subr.bf16.mxu0 %v1909_v34 }
 0x317   : > { %2468 = vmatpush3.bf16.xpose.msra.mxu0 %v1901_v39 }
 0x318   : > { %2469 = vmatprep.subr.bf16.mxu0 %v1910_v33 }
 0x31c   : > { %v2571_v35 = vpop.f32.mrb[84].mxu1 }
 0x31d   : > { %v1830_v36 = vadd.f32 %v2571_v35, %v3230_v24  ;;  %v1821_v40 = vpop.f32.mrb[85].mxu1 }
 0x31e   : > { %v1822_v41 = vadd.f32 %v3230_v24, %v1821_v40  ;;  %v2572_v42 = vpop.f32.mrb[86].mxu1 }
 0x31f   : > { %v1833_v44 = vadd.f32 %v2572_v42, %v3230_v24  ;;  %v1824_v43 = vpop.f32.mrb[87].mxu1  ;;  %2470 = vmatpush3.bf16.xpose.msra.mxu0 %v3242_v37  ;;  %v1890_v46 = vmax.f32 %v1830_v36, 0.0 }
 0x320   : > { %v1825_v45 = vadd.f32 %v3230_v24, %v1824_v43  ;;  %v1888_v48 = vmax.f32 %v1822_v41, 0.0 }
 0x321   : > { %v1891_v47 = vmax.f32 %v1833_v44, 0.0 }
 0x322   : > { %v1889_v49 = vmax.f32 %v1825_v45, 0.0 }
 0x323   : > { %v1912_v39 = vpack.c.bf16 %v1891_v47, %v1890_v46 }
 0x324   : > { %v1911_v50 = vpack.c.bf16 %v1889_v49, %v1888_v48 }
 0x326   : > { %2471 = vmatprep.subr.bf16.mxu0 %v1911_v50 }
 0x327   : > { %2472 = vmatpush3.bf16.xpose.msra.mxu0 %v1903_v55 }
 0x328   : > { %2473 = vmatprep.subr.bf16.mxu0 %v1912_v39 }
 0x32c   : > { %v2575_v51 = vpop.f32.mrb[88].mxu1 }
 0x32d   : > { %v1846_v52 = vadd.f32 %v2575_v51, %v3230_v24  ;;  %v1837_v53 = vpop.f32.mrb[89].mxu1 }
 0x32e   : > { %v1838_v56 = vadd.f32 %v3230_v24, %v1837_v53  ;;  %v2576_v57 = vpop.f32.mrb[90].mxu1 }
 0x32f   : > { %v1849_v37 = vadd.f32 %v2576_v57, %v3230_v24  ;;  %v1840_v58 = vpop.f32.mrb[91].mxu1  ;;  %2474 = vmatpush3.bf16.xpose.msra.mxu0 %v3248_v54  ;;  %v1894_v60 = vmax.f32 %v1846_v52, 0.0 }
 0x330   : > { %v1841_v59 = vadd.f32 %v3230_v24, %v1840_v58  ;;  %v1892_v62 = vmax.f32 %v1838_v56, 0.0 }
 0x331   : > { %v1895_v61 = vmax.f32 %v1849_v37, 0.0 }
 0x332   : > { %v1893_v63 = vmax.f32 %v1841_v59, 0.0 }
 0x333   : > { %v1914_v55 = vpack.c.bf16 %v1895_v61, %v1894_v60 }
 0x334   : > { %v1913_v0 = vpack.c.bf16 %v1893_v63, %v1892_v62 }
 0x336   : > { %2475 = vmatprep.subr.bf16.mxu0 %v1913_v0 }
 0x337   : > { %2476 = vmatpush3.bf16.xpose.msra.mxu0 %v3256_v5 }
 0x338   : > { %2477 = vmatprep.subr.bf16.mxu0 %v1914_v55 }
 0x33c   : > { %v2579_v1 = vpop.f32.mrb[92].mxu1 }
 0x33d   : > { %v1862_v2 = vadd.f32 %v2579_v1, %v3230_v24  ;;  %v1853_v3 = vpop.f32.mrb[93].mxu1 }
 0x33e   : > { %v1854_v6 = vadd.f32 %v3230_v24, %v1853_v3  ;;  %v2580_v7 = vpop.f32.mrb[94].mxu1 }
 0x33f   : > { %v1865_v54 = vadd.f32 %v2580_v7, %v3230_v24  ;;  %v1856_v8 = vpop.f32.mrb[95].mxu1  ;;  %2478 = vmatpush3.bf16.xpose.msra.mxu0 %v3254_v4  ;;  %v1898_v10 = vmax.f32 %v1862_v2, 0.0  ;;  %v1925_v4 = vsub.s32 0, %v1924_v16 }
 0x340   : > { %v1857_v9 = vadd.f32 %v3230_v24, %v1856_v8  ;;  %v1896_v12 = vmax.f32 %v1854_v6, 0.0  ;;  %v2832_v24 = vmov 1966171168  }
 0x341   : > { %v1899_v11 = vmax.f32 %v1865_v54, 0.0  ;;  %v1972_v20 = vunpack.c.l.s4 %v2832_v24  ;;  %v1926_v21 = vrot.slane %v1921_v17, %v1925_v4 }
 0x342   : > { %v1897_v5 = vmax.f32 %v1857_v9, 0.0 }
 0x343   : > { %v1916_v13 = vpack.c.bf16 %v1899_v11, %v1898_v10  ;;  %v1973_v22 = vunpack.c.0.s8 %v1972_v20 }
 0x344   : > { %v1915_v14 = vpack.c.bf16 %v1897_v5, %v1896_v12 }
 0x345   : > { %v1976_v27 = vsub.s32 %v1973_v22, %v1924_v16 }
 0x346   : > { %2479 = vmatprep.subr.bf16.mxu0 %v1915_v14 }
 0x347   : > { %2480 = vmatpush3.bf16.xpose.msra.mxu0 %v3264_v19 }
 0x348   : > { %2481 = vmatprep.subr.bf16.mxu0 %v1916_v13 }
 0x34f   : > { %2482 = vmatpush3.bf16.xpose.msra.mxu0 %v3262_v18 }
 0x356   : > { %2484 = vmatmul.mubr.bf16.vlgmr.msra.gmra.mrb[96].mxu0 %v3238_v31 }
 0x429   : > { %v1961_v23 = vpop.f32.mrb[96].mxu0 }
 0x42a   : > { %v1962_v25 = vadd.f32 %v1961_v23, %v1926_v21  ;;  %v1963_v26 = vpop.f32.mrb[97].mxu0 }
 0x42b   : > { %v1964_v19 = vadd.f32 %v1963_v26, %v1926_v21  ;;  %v1965_v18 = vpop.f32.mrb[98].mxu0 }
 0x42c   : > { %v1966_v28 = vpop.f32.mrb[99].mxu0 }
 0x42d   : > { %v1970_v31 = vcombine.low %v1962_v25, %v1964_v19 }
 0x42f   : > { %v1977_v38 = vrot.slane %v1970_v31, %v1976_v27 }
 0x431   : > { %v1984_v29 = vrot.slane %v1977_v38, %v1976_v27 }
 0x433   : > { %1990 = vst.msk [vmem:[%s330_s15] sm:$0x3] %vm1988_vm0, %v1984_v29 }
 0x434   : > { %2780 = shalt.err (!%p2777_p3)
}
 0x435   : > { %s2781_s28 = scalar_lea.hbm %s3294_s8, 32  ;;  %s2785_s10 = scalar_lea.hbm %s3345_s9, 64 }
 0x436   : > { %p2782_p4 = scmp.ne.s32.totalorder %s3294_s8, %s2781_s28  ;;  %p2786_p9 = scmp.lt.u32.totalorder %s3294_s8, %s3345_s9 }
 0x437   : > { %p2787_p10 = scmp.lt.u32.totalorder %s2785_s10, %s2781_s28  ;;  %p2789_p12 = scmp.lt.u32.totalorder %s2781_s28, %s3294_s8 }
 0x438   : > { %p2783_p7 = pnand %p2782_p4, %p2924_p5 }
 0x439   : > { %p2788_p11 = por %p2787_p10, %p2786_p9 }
 0x43a   : > { %p2784_p8 = pneg %p2783_p7 }
 0x43b   : > { %p2790_p13 = por %p2789_p12, %p2788_p11 }
 0x43d   : > { %p2791_p0 = pnand %p2790_p13, %p2784_p8 }
 0x43f   : > { %2794 = shalt.err (!%p2791_p0)
}
 0x440   : > { %2581 = dma.vmem_to_hbm [thread:$0]  (%p2924_p5), %s3296_s17, 32, %s3294_s8, %s1992_s30  }
 0x441 PF: > { %p2587_p1 = scmp.ge.s32.totalorder %s2829_s14, 2  ;;  %s2018_s18 = sand.u32 1, %s2817_s11  }
 0x442   : > { %s2019_s23 = scalar_lea.sflag [#allocation4], %s2018_s18 }
 0x443   : > { %p2584_p2 = pnand %p2587_p1, %p2928_p6 }
 0x445   : > { %2812 = dma.done.wait (!%p2584_p2), %s2019_s23, 32  }
 0x446   : > { %2814 = vsyncadd (!%p2584_p2), %s2019_s23, 4294967264  ;;  %p21_p3 = scmp.ge.s32.totalorder %s2910_s16, 4   ;;  %s3348_s11 = smov %s2821_s12 }
 0x447   : > { %s3349_s12 = smov %s2825_s13  ;;  %s3350_s13 = smov %s2922_s19 }
 0x448   : > { %s3351_s14 = smov %s2910_s16  ;;  %23 = sbr.rel (!%p21_p3) target bundleno = 6 (0x6), region = 91 }
 0x44f   :  { %2024 = vsyncpa [#allocation4], 1 }
 0x450   :  { %2026 = vsyncpa [#allocation4 + $0x1], 1 }

</bundles_post_ra>
